<compile_context>
chip_gen: v6e
topology: v6e:2x2x1
jax: 0.10.0
libtpu: 0.0.40
codegen_flags: <defaults>
</compile_context>

<pallas_src>
import functools

import jax
import jax.numpy as jnp
from jax import lax
from jax.experimental import pallas as pl
from jax.experimental.pallas import tpu as pltpu


def _round_up(x, m):
    return (x + m - 1) // m * m


def _lstm_kernel(emb_ref, wih_ref, bias_ref, whh_hbm, hc_ref,
                 whh_vmem, gx_sc, h_sc, c_sc, whh_sem,
                 *, t_blk, bp, hp, seq_len, masked, unroll):
    """One grid step = one chunk of T_BLK timesteps.

    emb_ref : (T_BLK*BP, E)   raw embedded inputs for this chunk (time-major, row s*BP+b)
    wih_ref : (E, 4*HP)       input weight (gate order [i,f,o,g]), tiny, auto-pipelined
    bias_ref: (1, 4*HP)       b_ih + b_hh, permuted/padded
    whh_hbm : (HP, 4*HP)      recurrent weight, raw HBM ref (memory_space=pl.ANY)
    hc_ref  : (2, BP, HP)     output slab [h ; c], written once at the last chunk
    whh_vmem: (HP, 4*HP)      single-buffered VMEM copy of W_hh^T
    gx_sc   : (T_BLK*BP, 4*HP) per-chunk precomputed input gates
    h_sc/c_sc: (BP, HP)       VMEM-carried recurrent state
    """
    t_chunk = pl.program_id(0)

    @pl.when(t_chunk == 0)
    def _():
        # One-time copy of the loop-invariant recurrent weight into a single-buffered
        # VMEM scratch (avoids the default double-buffered BlockSpec pipeline).
        cp = pltpu.make_async_copy(whh_hbm, whh_vmem, whh_sem)
        cp.start()
        cp.wait()
        h_sc[...] = jnp.zeros_like(h_sc)
        c_sc[...] = jnp.zeros_like(c_sc)

    # Per-chunk input projection: one big MXU-friendly matmul, off the serial loop.
    gx_sc[...] = (
        jnp.dot(emb_ref[...], wih_ref[...], preferred_element_type=jnp.float32)
        + bias_ref[...]
    )

    whh = whh_vmem[...]  # resident; read once per chunk

    def step(s, carry):
        h, c = carry
        row = pl.multiple_of(s * bp, 8)  # BP is a multiple of 8 -> aligned slice
        # Only the h-dependent matmul sits on the serial critical path.
        gates = gx_sc[pl.ds(row, bp), :] + jnp.dot(
            h, whh, preferred_element_type=jnp.float32)

        # Gate order [i | f | o | g]: one wide sigmoid, one tanh (2 EUP pushes).
        sig = jax.nn.sigmoid(gates[:, : 3 * hp])
        g_g = jnp.tanh(gates[:, 3 * hp:])
        i_g = sig[:, :hp]
        f_g = sig[:, hp:2 * hp]
        o_g = sig[:, 2 * hp:3 * hp]

        c_new = f_g * c + i_g * g_g
        h_new = o_g * jnp.tanh(c_new)

        if masked:  # only emitted when seq_len is not a multiple of T_BLK
            valid = (t_chunk * t_blk + s) < seq_len
            h_new = jnp.where(valid, h_new, h)
            c_new = jnp.where(valid, c_new, c)
        return h_new, c_new

    h, c = lax.fori_loop(0, t_blk, step, (h_sc[...], c_sc[...]), unroll=unroll)
    h_sc[...] = h
    c_sc[...] = c

    # The PyTorch loop returns only the last timestep's output + final (h, c).
    @pl.when(t_chunk == pl.num_programs(0) - 1)
    def _():
        hc_ref[0] = h.astype(hc_ref.dtype)
        hc_ref[1] = c.astype(hc_ref.dtype)


def encoder_rnn_forward(sentences, embedding, w_ih, w_hh, b_ih, b_hh):
    """Mirrors EncoderRNN.forward for n_layers=1.

    sentences: (B, S) int32 token ids
    embedding: (V, E) float32
    w_ih: (4H, E), w_hh: (4H, H), b_ih/b_hh: (4H,)   (PyTorch layout, gate order i,f,g,o)
    Returns (output, (h, c)) with shapes (1, B, H), (1, B, H), (1, B, H).
    (nn.LSTM's last-step output equals the final hidden state for a single layer.)
    """
    B, S = sentences.shape
    E = embedding.shape[1]
    H = w_hh.shape[1]

    # ---- static padding / blocking parameters --------------------------------------
    HP = max(128, _round_up(H, 128))      # lane-aligned hidden size
    BP = max(8, _round_up(B, 8))          # sublane-aligned batch (no batch split: 1 TC)
    T_BLK = min(S, 64)                    # timesteps per grid step (amortize grid cost)
    S_PAD = _round_up(S, T_BLK)
    N_CHUNKS = S_PAD // T_BLK
    masked = S_PAD != S
    unroll = True if HP < 512 else 8      # cap unroll at large H to avoid vreg spills

    # ---- gate permutation [i, f, g, o] -> [i, f, o, g] and zero-padding to Hp -------
    def permute_pad_gate_dim(w):
        # w: (4H, ...) -> (4*HP, ...), per-gate zero-padded, gate order [i, f, o, g]
        gi, gf, gg, go = (w[k * H:(k + 1) * H] for k in range(4))
        pad_cfg = [(0, HP - H)] + [(0, 0)] * (w.ndim - 1)
        return jnp.concatenate(
            [jnp.pad(p, pad_cfg) for p in (gi, gf, go, gg)], axis=0)

    wih_p = permute_pad_gate_dim(w_ih.astype(jnp.float32))            # (4HP, E)
    whh_p = permute_pad_gate_dim(w_hh.astype(jnp.float32))            # (4HP, H)
    whh_p = jnp.pad(whh_p, ((0, 0), (0, HP - H)))                     # (4HP, HP)
    bias_p = permute_pad_gate_dim((b_ih + b_hh).astype(jnp.float32))  # (4HP,)

    wih_t = jnp.transpose(wih_p)            # (E, 4HP)
    whh_t = jnp.transpose(whh_p)            # (HP, 4HP)
    bias_2d = bias_p[None, :]               # (1, 4HP)

    # ---- glue: embedding gather only; projection moves into the kernel --------------
    embedded = embedding[sentences].astype(jnp.float32)        # (B, S, E)
    embedded = jnp.transpose(embedded, (1, 0, 2))              # (S, B, E) time-major
    embedded = jnp.pad(embedded, ((0, S_PAD - S), (0, BP - B), (0, 0)))
    embedded_2d = embedded.reshape(S_PAD * BP, E)              # rows = [t-major, then b]

    # ---- explicit VMEM budget (inputs double-buffered, scratch single) ---------------
    f32b = 4
    vmem_needed = (
        T_BLK * BP * E * f32b * 2            # embedded chunk (double-buffered)
        + E * 4 * HP * f32b * 2              # W_ih^T
        + 8 * 4 * HP * f32b * 2              # bias (sublane-padded)
        + 2 * BP * HP * f32b * 2             # hc output
        + HP * 4 * HP * f32b                 # W_hh^T scratch (single-buffered)
        + T_BLK * BP * 4 * HP * f32b         # per-chunk gates scratch
        + 2 * BP * HP * f32b                 # h/c carries
    )
    vmem_limit = int(min(max(2 * vmem_needed, 16 << 20), 64 << 20))

    kernel = functools.partial(
        _lstm_kernel, t_blk=T_BLK, bp=BP, hp=HP,
        seq_len=S, masked=masked, unroll=unroll)

    hc = pl.pallas_call(
        kernel,
        out_shape=jax.ShapeDtypeStruct((2, BP, HP), jnp.float32),
        grid_spec=pltpu.PrefetchScalarGridSpec(
            num_scalar_prefetch=0,
            grid=(N_CHUNKS,),
            in_specs=[
                # raw embedded chunk for this time block
                pl.BlockSpec((T_BLK * BP, E), lambda t: (t, 0)),
                # small constants, auto-pipelined (constant index_map keeps resident)
                pl.BlockSpec((E, 4 * HP), lambda t: (0, 0)),
                pl.BlockSpec((1, 4 * HP), lambda t: (0, 0)),
                # recurrent weight: raw HBM ref, copied once into single-buffered VMEM
                pl.BlockSpec(memory_space=pl.ANY),
            ],
            out_specs=pl.BlockSpec((2, BP, HP), lambda t: (0, 0, 0)),
            scratch_shapes=[
                pltpu.VMEM((HP, 4 * HP), jnp.float32),            # W_hh^T (resident)
                pltpu.VMEM((T_BLK * BP, 4 * HP), jnp.float32),    # per-chunk gates_x
                pltpu.VMEM((BP, HP), jnp.float32),                # h carry
                pltpu.VMEM((BP, HP), jnp.float32),                # c carry
                pltpu.SemaphoreType.DMA(()),                      # W_hh copy semaphore
            ],
        ),
        compiler_params=pltpu.CompilerParams(
            dimension_semantics=("arbitrary",),   # serial recurrence over time chunks
            vmem_limit_bytes=vmem_limit,
        ),
    )(embedded_2d, wih_t, bias_2d, whh_t)

    h = hc[0, :B, :H][None]    # (1, B, H)
    c = hc[1, :B, :H][None]    # (1, B, H)
    output = h                 # last-step LSTM output == final hidden state (1 layer)
    return output, (h, c)


def _reference_forward(sentences, embedding, w_ih, w_hh, b_ih, b_hh):
    """Pure-JAX reference (PyTorch LSTM semantics, gate order i,f,g,o)."""
    B, S = sentences.shape
    H = w_hh.shape[1]
    embedded = jnp.transpose(embedding[sentences], (1, 0, 2)).astype(jnp.float32)
    wih_t = jnp.transpose(w_ih).astype(jnp.float32)
    whh_t = jnp.transpose(w_hh).astype(jnp.float32)
    bias = (b_ih + b_hh).astype(jnp.float32)

    def step(carry, x):
        h, c = carry
        gates = (jnp.dot(x, wih_t, precision=lax.Precision.HIGHEST)
                 + jnp.dot(h, whh_t, precision=lax.Precision.HIGHEST) + bias)
        i = jax.nn.sigmoid(gates[:, 0 * H:1 * H])
        f = jax.nn.sigmoid(gates[:, 1 * H:2 * H])
        g = jnp.tanh(gates[:, 2 * H:3 * H])
        o = jax.nn.sigmoid(gates[:, 3 * H:4 * H])
        c_new = f * c + i * g
        h_new = o * jnp.tanh(c_new)
        return (h_new, c_new), h_new

    h0 = jnp.zeros((B, H), jnp.float32)
    c0 = jnp.zeros((B, H), jnp.float32)
    (h_f, c_f), _ = lax.scan(step, (h0, c0), embedded)
    return h_f[None], (h_f[None], c_f[None])


if __name__ == "__main__":
    # Small shapes consistent with the module.
    vocab_size = 50
    embedding_size = 16
    hidden_size = 32
    batch = 2
    seq_len = 8

    key = jax.random.PRNGKey(0)
    k_emb, k_wih, k_whh, k_bih, k_bhh, k_tok = jax.random.split(key, 6)

    embedding = jax.random.normal(k_emb, (vocab_size, embedding_size), jnp.float32) * 0.1
    w_ih = jax.random.normal(k_wih, (4 * hidden_size, embedding_size), jnp.float32) * 0.1
    w_hh = jax.random.normal(k_whh, (4 * hidden_size, hidden_size), jnp.float32) * 0.1
    b_ih = jax.random.normal(k_bih, (4 * hidden_size,), jnp.float32) * 0.1
    b_hh = jax.random.normal(k_bhh, (4 * hidden_size,), jnp.float32) * 0.1

    sentences = jax.random.randint(k_tok, (batch, seq_len), 0, vocab_size, jnp.int32)

    output, (h, c) = encoder_rnn_forward(sentences, embedding, w_ih, w_hh, b_ih, b_hh)
    jax.block_until_ready((output, h, c))

    out_ref, (h_ref, c_ref) = _reference_forward(sentences, embedding, w_ih, w_hh, b_ih, b_hh)

    assert output.shape == (1, batch, hidden_size)
    assert h.shape == (1, batch, hidden_size)
    assert c.shape == (1, batch, hidden_size)
    assert jnp.allclose(output, out_ref, atol=1e-4, rtol=1e-4)
    assert jnp.allclose(h, h_ref, atol=1e-4, rtol=1e-4)
    assert jnp.allclose(c, c_ref, atol=1e-4, rtol=1e-4)

    print("KERNEL_OK")
</pallas_src>

<mosaic_0001>
module attributes {stable_mosaic.version = 11 : i64} {
  func.func @_lstm_kernel(%arg0: i32, %arg1: memref<64x16xf32, #tpu.memory_space<vmem>>, %arg2: memref<16x512xf32, #tpu.memory_space<vmem>>, %arg3: memref<1x512xf32, #tpu.memory_space<vmem>>, %arg4: memref<128x512xf32, #tpu.memory_space<any>>, %arg5: memref<2x8x128xf32, #tpu.memory_space<vmem>>, %arg6: memref<128x512xf32, #tpu.memory_space<vmem>>, %arg7: memref<64x512xf32, #tpu.memory_space<vmem>>, %arg8: memref<8x128xf32, #tpu.memory_space<vmem>>, %arg9: memref<8x128xf32, #tpu.memory_space<vmem>>, %arg10: memref<!tpu.dma_semaphore, #tpu.memory_space<semaphore_mem>>) attributes {dimension_semantics = [#tpu.dimension_semantics<arbitrary>], iteration_bounds = array<i64: 1>, scalar_prefetch = 0 : i64, scratch_operands = 5 : i64, tpu.core_type = #tpu.core_type<tc>, window_params = [{transform_indices = @transform_0, window_bounds = array<i64: 64, 16>}, {pipeline_mode = #tpu.pipeline_mode<synchronous>, transform_indices = @transform_1, window_bounds = array<i64: 16, 512>}, {pipeline_mode = #tpu.pipeline_mode<synchronous>, transform_indices = @transform_2, window_bounds = array<i64: 1, 512>}, {}, {pipeline_mode = #tpu.pipeline_mode<synchronous>, transform_indices = @transform_4, window_bounds = array<i64: 2, 8, 128>}]} {
    %c0_i32 = arith.constant 0 : i32
    %0 = arith.cmpi eq, %arg0, %c0_i32 : i32
    %1 = arith.extui %0 : i1 to i32
    %c0_i32_0 = arith.constant 0 : i32
    %2 = arith.cmpi ne, %1, %c0_i32_0 : i32
    scf.if %2 {
      tpu.enqueue_dma source(%arg4 : memref<128x512xf32, #tpu.memory_space<any>>) target(%arg6 : memref<128x512xf32, #tpu.memory_space<vmem>>) target_semaphore(%arg10 : memref<!tpu.dma_semaphore, #tpu.memory_space<semaphore_mem>>)
      tpu.wait_dma2 semaphore(%arg10 : memref<!tpu.dma_semaphore, #tpu.memory_space<semaphore_mem>>) src(%arg4 : memref<128x512xf32, #tpu.memory_space<any>>) dst(%arg6 : memref<128x512xf32, #tpu.memory_space<vmem>>)
      %cst_53 = arith.constant 0.000000e+00 : f32
      %194 = vector.broadcast %cst_53 : f32 to vector<8x128xf32>
      %c0_54 = arith.constant 0 : index
      %c0_55 = arith.constant 0 : index
      %195 = vector.load %arg8[%c0_54, %c0_55] : memref<8x128xf32, #tpu.memory_space<vmem>>, vector<8x128xf32>
      tpu.vector_store %arg8[%c0_54, %c0_55], %194 {strides = array<i32>} : memref<8x128xf32, #tpu.memory_space<vmem>>, vector<8x128xf32>,
      %cst_56 = arith.constant 0.000000e+00 : f32
      %196 = vector.broadcast %cst_56 : f32 to vector<8x128xf32>
      %c0_57 = arith.constant 0 : index
      %c0_58 = arith.constant 0 : index
      %197 = vector.load %arg9[%c0_57, %c0_58] : memref<8x128xf32, #tpu.memory_space<vmem>>, vector<8x128xf32>
      tpu.vector_store %arg9[%c0_57, %c0_58], %196 {strides = array<i32>} : memref<8x128xf32, #tpu.memory_space<vmem>>, vector<8x128xf32>,
    } else {
    }
    %c0 = arith.constant 0 : index
    %c0_1 = arith.constant 0 : index
    %3 = vector.load %arg1[%c0, %c0_1] : memref<64x16xf32, #tpu.memory_space<vmem>>, vector<64x16xf32>
    %c0_2 = arith.constant 0 : index
    %c0_3 = arith.constant 0 : index
    %4 = vector.load %arg2[%c0_2, %c0_3] : memref<16x512xf32, #tpu.memory_space<vmem>>, vector<16x512xf32>
    %cst = arith.constant dense<0.000000e+00> : vector<64x512xf32>
    %5 = tpu.matmul %3, %4, %cst {dimension_numbers = #tpu.dot_dimension_numbers<[1], [0], [0], [1], [0, 0, 1, 1], [], []>} : vector<64x16xf32>, vector<16x512xf32>, vector<64x512xf32> -> vector<64x512xf32>
    %c0_4 = arith.constant 0 : index
    %c0_5 = arith.constant 0 : index
    %6 = vector.load %arg3[%c0_4, %c0_5] : memref<1x512xf32, #tpu.memory_space<vmem>>, vector<1x512xf32>
    %7 = vector.broadcast %6 : vector<1x512xf32> to vector<64x512xf32>
    %8 = arith.addf %5, %7 : vector<64x512xf32>
    %c0_6 = arith.constant 0 : index
    %c0_7 = arith.constant 0 : index
    %9 = vector.load %arg7[%c0_6, %c0_7] : memref<64x512xf32, #tpu.memory_space<vmem>>, vector<64x512xf32>
    tpu.vector_store %arg7[%c0_6, %c0_7], %8 {strides = array<i32>} : memref<64x512xf32, #tpu.memory_space<vmem>>, vector<64x512xf32>,
    %c0_8 = arith.constant 0 : index
    %c0_9 = arith.constant 0 : index
    %10 = vector.load %arg6[%c0_8, %c0_9] : memref<128x512xf32, #tpu.memory_space<vmem>>, vector<128x512xf32>
    %c0_10 = arith.constant 0 : index
    %c0_11 = arith.constant 0 : index
    %11 = vector.load %arg8[%c0_10, %c0_11] : memref<8x128xf32, #tpu.memory_space<vmem>>, vector<8x128xf32>
    %c0_12 = arith.constant 0 : index
    %c0_13 = arith.constant 0 : index
    %12 = vector.load %arg9[%c0_12, %c0_13] : memref<8x128xf32, #tpu.memory_space<vmem>>, vector<8x128xf32>
    %c0_i32_14 = arith.constant 0 : i32
    %c8_i32 = arith.constant 8 : i32
    %13 = arith.muli %c0_i32_14, %c8_i32 : i32
    %14 = tpu.assume_multiple %13, 8 : i32
    %15 = arith.index_cast %14 : i32 to index
    %c0_15 = arith.constant 0 : index
    %16 = vector.load %arg7[%15, %c0_15] : memref<64x512xf32, #tpu.memory_space<vmem>>, vector<8x512xf32>
    %cst_16 = arith.constant dense<0.000000e+00> : vector<8x512xf32>
    %17 = tpu.matmul %11, %10, %cst_16 {dimension_numbers = #tpu.dot_dimension_numbers<[1], [0], [0], [1], [0, 0, 1, 1], [], []>} : vector<8x128xf32>, vector<128x512xf32>, vector<8x512xf32> -> vector<8x512xf32>
    %18 = arith.addf %16, %17 : vector<8x512xf32>
    %19 = vector.extract_strided_slice %18 {offsets = [0, 0], sizes = [8, 384], strides = [1, 1]} : vector<8x512xf32> to vector<8x384xf32>
    %20 = arith.negf %19 : vector<8x384xf32>
    %21 = math.exp %20 : vector<8x384xf32>
    %cst_17 = arith.constant 1.000000e+00 : f32
    %22 = vector.broadcast %cst_17 : f32 to vector<8x384xf32>
    %23 = arith.addf %22, %21 : vector<8x384xf32>
    %24 = arith.divf %22, %23 : vector<8x384xf32>
    %25 = vector.extract_strided_slice %18 {offsets = [0, 384], sizes = [8, 128], strides = [1, 1]} : vector<8x512xf32> to vector<8x128xf32>
    %26 = math.tanh %25 : vector<8x128xf32>
    %27 = vector.extract_strided_slice %24 {offsets = [0, 0], sizes = [8, 128], strides = [1, 1]} : vector<8x384xf32> to vector<8x128xf32>
    %28 = vector.extract_strided_slice %24 {offsets = [0, 128], sizes = [8, 128], strides = [1, 1]} : vector<8x384xf32> to vector<8x128xf32>
    %29 = vector.extract_strided_slice %24 {offsets = [0, 256], sizes = [8, 128], strides = [1, 1]} : vector<8x384xf32> to vector<8x128xf32>
    %30 = arith.mulf %28, %12 : vector<8x128xf32>
    %31 = arith.mulf %27, %26 : vector<8x128xf32>
    %32 = arith.addf %30, %31 : vector<8x128xf32>
    %33 = math.tanh %32 : vector<8x128xf32>
    %34 = arith.mulf %29, %33 : vector<8x128xf32>
    %c1_i32 = arith.constant 1 : i32
    %c8_i32_18 = arith.constant 8 : i32
    %35 = arith.muli %c1_i32, %c8_i32_18 : i32
    %36 = tpu.assume_multiple %35, 8 : i32
    %37 = arith.index_cast %36 : i32 to index
    %c0_19 = arith.constant 0 : index
    %38 = vector.load %arg7[%37, %c0_19] : memref<64x512xf32, #tpu.memory_space<vmem>>, vector<8x512xf32>
    %cst_20 = arith.constant dense<0.000000e+00> : vector<8x512xf32>
    %39 = tpu.matmul %34, %10, %cst_20 {dimension_numbers = #tpu.dot_dimension_numbers<[1], [0], [0], [1], [0, 0, 1, 1], [], []>} : vector<8x128xf32>, vector<128x512xf32>, vector<8x512xf32> -> vector<8x512xf32>
    %40 = arith.addf %38, %39 : vector<8x512xf32>
    %41 = vector.extract_strided_slice %40 {offsets = [0, 0], sizes = [8, 384], strides = [1, 1]} : vector<8x512xf32> to vector<8x384xf32>
    %42 = arith.negf %41 : vector<8x384xf32>
    %43 = math.exp %42 : vector<8x384xf32>
    %cst_21 = arith.constant 1.000000e+00 : f32
    %44 = vector.broadcast %cst_21 : f32 to vector<8x384xf32>
    %45 = arith.addf %44, %43 : vector<8x384xf32>
    %46 = arith.divf %44, %45 : vector<8x384xf32>
    %47 = vector.extract_strided_slice %40 {offsets = [0, 384], sizes = [8, 128], strides = [1, 1]} : vector<8x512xf32> to vector<8x128xf32>
    %48 = math.tanh %47 : vector<8x128xf32>
    %49 = vector.extract_strided_slice %46 {offsets = [0, 0], sizes = [8, 128], strides = [1, 1]} : vector<8x384xf32> to vector<8x128xf32>
    %50 = vector.extract_strided_slice %46 {offsets = [0, 128], sizes = [8, 128], strides = [1, 1]} : vector<8x384xf32> to vector<8x128xf32>
    %51 = vector.extract_strided_slice %46 {offsets = [0, 256], sizes = [8, 128], strides = [1, 1]} : vector<8x384xf32> to vector<8x128xf32>
    %52 = arith.mulf %50, %32 : vector<8x128xf32>
    %53 = arith.mulf %49, %48 : vector<8x128xf32>
    %54 = arith.addf %52, %53 : vector<8x128xf32>
    %55 = math.tanh %54 : vector<8x128xf32>
    %56 = arith.mulf %51, %55 : vector<8x128xf32>
    %c2_i32 = arith.constant 2 : i32
    %c8_i32_22 = arith.constant 8 : i32
    %57 = arith.muli %c2_i32, %c8_i32_22 : i32
    %58 = tpu.assume_multiple %57, 8 : i32
    %59 = arith.index_cast %58 : i32 to index
    %c0_23 = arith.constant 0 : index
    %60 = vector.load %arg7[%59, %c0_23] : memref<64x512xf32, #tpu.memory_space<vmem>>, vector<8x512xf32>
    %cst_24 = arith.constant dense<0.000000e+00> : vector<8x512xf32>
    %61 = tpu.matmul %56, %10, %cst_24 {dimension_numbers = #tpu.dot_dimension_numbers<[1], [0], [0], [1], [0, 0, 1, 1], [], []>} : vector<8x128xf32>, vector<128x512xf32>, vector<8x512xf32> -> vector<8x512xf32>
    %62 = arith.addf %60, %61 : vector<8x512xf32>
    %63 = vector.extract_strided_slice %62 {offsets = [0, 0], sizes = [8, 384], strides = [1, 1]} : vector<8x512xf32> to vector<8x384xf32>
    %64 = arith.negf %63 : vector<8x384xf32>
    %65 = math.exp %64 : vector<8x384xf32>
    %cst_25 = arith.constant 1.000000e+00 : f32
    %66 = vector.broadcast %cst_25 : f32 to vector<8x384xf32>
    %67 = arith.addf %66, %65 : vector<8x384xf32>
    %68 = arith.divf %66, %67 : vector<8x384xf32>
    %69 = vector.extract_strided_slice %62 {offsets = [0, 384], sizes = [8, 128], strides = [1, 1]} : vector<8x512xf32> to vector<8x128xf32>
    %70 = math.tanh %69 : vector<8x128xf32>
    %71 = vector.extract_strided_slice %68 {offsets = [0, 0], sizes = [8, 128], strides = [1, 1]} : vector<8x384xf32> to vector<8x128xf32>
    %72 = vector.extract_strided_slice %68 {offsets = [0, 128], sizes = [8, 128], strides = [1, 1]} : vector<8x384xf32> to vector<8x128xf32>
    %73 = vector.extract_strided_slice %68 {offsets = [0, 256], sizes = [8, 128], strides = [1, 1]} : vector<8x384xf32> to vector<8x128xf32>
    %74 = arith.mulf %72, %54 : vector<8x128xf32>
    %75 = arith.mulf %71, %70 : vector<8x128xf32>
    %76 = arith.addf %74, %75 : vector<8x128xf32>
    %77 = math.tanh %76 : vector<8x128xf32>
    %78 = arith.mulf %73, %77 : vector<8x128xf32>
    %c3_i32 = arith.constant 3 : i32
    %c8_i32_26 = arith.constant 8 : i32
    %79 = arith.muli %c3_i32, %c8_i32_26 : i32
    %80 = tpu.assume_multiple %79, 8 : i32
    %81 = arith.index_cast %80 : i32 to index
    %c0_27 = arith.constant 0 : index
    %82 = vector.load %arg7[%81, %c0_27] : memref<64x512xf32, #tpu.memory_space<vmem>>, vector<8x512xf32>
    %cst_28 = arith.constant dense<0.000000e+00> : vector<8x512xf32>
    %83 = tpu.matmul %78, %10, %cst_28 {dimension_numbers = #tpu.dot_dimension_numbers<[1], [0], [0], [1], [0, 0, 1, 1], [], []>} : vector<8x128xf32>, vector<128x512xf32>, vector<8x512xf32> -> vector<8x512xf32>
    %84 = arith.addf %82, %83 : vector<8x512xf32>
    %85 = vector.extract_strided_slice %84 {offsets = [0, 0], sizes = [8, 384], strides = [1, 1]} : vector<8x512xf32> to vector<8x384xf32>
    %86 = arith.negf %85 : vector<8x384xf32>
    %87 = math.exp %86 : vector<8x384xf32>
    %cst_29 = arith.constant 1.000000e+00 : f32
    %88 = vector.broadcast %cst_29 : f32 to vector<8x384xf32>
    %89 = arith.addf %88, %87 : vector<8x384xf32>
    %90 = arith.divf %88, %89 : vector<8x384xf32>
    %91 = vector.extract_strided_slice %84 {offsets = [0, 384], sizes = [8, 128], strides = [1, 1]} : vector<8x512xf32> to vector<8x128xf32>
    %92 = math.tanh %91 : vector<8x128xf32>
    %93 = vector.extract_strided_slice %90 {offsets = [0, 0], sizes = [8, 128], strides = [1, 1]} : vector<8x384xf32> to vector<8x128xf32>
    %94 = vector.extract_strided_slice %90 {offsets = [0, 128], sizes = [8, 128], strides = [1, 1]} : vector<8x384xf32> to vector<8x128xf32>
    %95 = vector.extract_strided_slice %90 {offsets = [0, 256], sizes = [8, 128], strides = [1, 1]} : vector<8x384xf32> to vector<8x128xf32>
    %96 = arith.mulf %94, %76 : vector<8x128xf32>
    %97 = arith.mulf %93, %92 : vector<8x128xf32>
    %98 = arith.addf %96, %97 : vector<8x128xf32>
    %99 = math.tanh %98 : vector<8x128xf32>
    %100 = arith.mulf %95, %99 : vector<8x128xf32>
    %c4_i32 = arith.constant 4 : i32
    %c8_i32_30 = arith.constant 8 : i32
    %101 = arith.muli %c4_i32, %c8_i32_30 : i32
    %102 = tpu.assume_multiple %101, 8 : i32
    %103 = arith.index_cast %102 : i32 to index
    %c0_31 = arith.constant 0 : index
    %104 = vector.load %arg7[%103, %c0_31] : memref<64x512xf32, #tpu.memory_space<vmem>>, vector<8x512xf32>
    %cst_32 = arith.constant dense<0.000000e+00> : vector<8x512xf32>
    %105 = tpu.matmul %100, %10, %cst_32 {dimension_numbers = #tpu.dot_dimension_numbers<[1], [0], [0], [1], [0, 0, 1, 1], [], []>} : vector<8x128xf32>, vector<128x512xf32>, vector<8x512xf32> -> vector<8x512xf32>
    %106 = arith.addf %104, %105 : vector<8x512xf32>
    %107 = vector.extract_strided_slice %106 {offsets = [0, 0], sizes = [8, 384], strides = [1, 1]} : vector<8x512xf32> to vector<8x384xf32>
    %108 = arith.negf %107 : vector<8x384xf32>
    %109 = math.exp %108 : vector<8x384xf32>
    %cst_33 = arith.constant 1.000000e+00 : f32
    %110 = vector.broadcast %cst_33 : f32 to vector<8x384xf32>
    %111 = arith.addf %110, %109 : vector<8x384xf32>
    %112 = arith.divf %110, %111 : vector<8x384xf32>
    %113 = vector.extract_strided_slice %106 {offsets = [0, 384], sizes = [8, 128], strides = [1, 1]} : vector<8x512xf32> to vector<8x128xf32>
    %114 = math.tanh %113 : vector<8x128xf32>
    %115 = vector.extract_strided_slice %112 {offsets = [0, 0], sizes = [8, 128], strides = [1, 1]} : vector<8x384xf32> to vector<8x128xf32>
    %116 = vector.extract_strided_slice %112 {offsets = [0, 128], sizes = [8, 128], strides = [1, 1]} : vector<8x384xf32> to vector<8x128xf32>
    %117 = vector.extract_strided_slice %112 {offsets = [0, 256], sizes = [8, 128], strides = [1, 1]} : vector<8x384xf32> to vector<8x128xf32>
    %118 = arith.mulf %116, %98 : vector<8x128xf32>
    %119 = arith.mulf %115, %114 : vector<8x128xf32>
    %120 = arith.addf %118, %119 : vector<8x128xf32>
    %121 = math.tanh %120 : vector<8x128xf32>
    %122 = arith.mulf %117, %121 : vector<8x128xf32>
    %c5_i32 = arith.constant 5 : i32
    %c8_i32_34 = arith.constant 8 : i32
    %123 = arith.muli %c5_i32, %c8_i32_34 : i32
    %124 = tpu.assume_multiple %123, 8 : i32
    %125 = arith.index_cast %124 : i32 to index
    %c0_35 = arith.constant 0 : index
    %126 = vector.load %arg7[%125, %c0_35] : memref<64x512xf32, #tpu.memory_space<vmem>>, vector<8x512xf32>
    %cst_36 = arith.constant dense<0.000000e+00> : vector<8x512xf32>
    %127 = tpu.matmul %122, %10, %cst_36 {dimension_numbers = #tpu.dot_dimension_numbers<[1], [0], [0], [1], [0, 0, 1, 1], [], []>} : vector<8x128xf32>, vector<128x512xf32>, vector<8x512xf32> -> vector<8x512xf32>
    %128 = arith.addf %126, %127 : vector<8x512xf32>
    %129 = vector.extract_strided_slice %128 {offsets = [0, 0], sizes = [8, 384], strides = [1, 1]} : vector<8x512xf32> to vector<8x384xf32>
    %130 = arith.negf %129 : vector<8x384xf32>
    %131 = math.exp %130 : vector<8x384xf32>
    %cst_37 = arith.constant 1.000000e+00 : f32
    %132 = vector.broadcast %cst_37 : f32 to vector<8x384xf32>
    %133 = arith.addf %132, %131 : vector<8x384xf32>
    %134 = arith.divf %132, %133 : vector<8x384xf32>
    %135 = vector.extract_strided_slice %128 {offsets = [0, 384], sizes = [8, 128], strides = [1, 1]} : vector<8x512xf32> to vector<8x128xf32>
    %136 = math.tanh %135 : vector<8x128xf32>
    %137 = vector.extract_strided_slice %134 {offsets = [0, 0], sizes = [8, 128], strides = [1, 1]} : vector<8x384xf32> to vector<8x128xf32>
    %138 = vector.extract_strided_slice %134 {offsets = [0, 128], sizes = [8, 128], strides = [1, 1]} : vector<8x384xf32> to vector<8x128xf32>
    %139 = vector.extract_strided_slice %134 {offsets = [0, 256], sizes = [8, 128], strides = [1, 1]} : vector<8x384xf32> to vector<8x128xf32>
    %140 = arith.mulf %138, %120 : vector<8x128xf32>
    %141 = arith.mulf %137, %136 : vector<8x128xf32>
    %142 = arith.addf %140, %141 : vector<8x128xf32>
    %143 = math.tanh %142 : vector<8x128xf32>
    %144 = arith.mulf %139, %143 : vector<8x128xf32>
    %c6_i32 = arith.constant 6 : i32
    %c8_i32_38 = arith.constant 8 : i32
    %145 = arith.muli %c6_i32, %c8_i32_38 : i32
    %146 = tpu.assume_multiple %145, 8 : i32
    %147 = arith.index_cast %146 : i32 to index
    %c0_39 = arith.constant 0 : index
    %148 = vector.load %arg7[%147, %c0_39] : memref<64x512xf32, #tpu.memory_space<vmem>>, vector<8x512xf32>
    %cst_40 = arith.constant dense<0.000000e+00> : vector<8x512xf32>
    %149 = tpu.matmul %144, %10, %cst_40 {dimension_numbers = #tpu.dot_dimension_numbers<[1], [0], [0], [1], [0, 0, 1, 1], [], []>} : vector<8x128xf32>, vector<128x512xf32>, vector<8x512xf32> -> vector<8x512xf32>
    %150 = arith.addf %148, %149 : vector<8x512xf32>
    %151 = vector.extract_strided_slice %150 {offsets = [0, 0], sizes = [8, 384], strides = [1, 1]} : vector<8x512xf32> to vector<8x384xf32>
    %152 = arith.negf %151 : vector<8x384xf32>
    %153 = math.exp %152 : vector<8x384xf32>
    %cst_41 = arith.constant 1.000000e+00 : f32
    %154 = vector.broadcast %cst_41 : f32 to vector<8x384xf32>
    %155 = arith.addf %154, %153 : vector<8x384xf32>
    %156 = arith.divf %154, %155 : vector<8x384xf32>
    %157 = vector.extract_strided_slice %150 {offsets = [0, 384], sizes = [8, 128], strides = [1, 1]} : vector<8x512xf32> to vector<8x128xf32>
    %158 = math.tanh %157 : vector<8x128xf32>
    %159 = vector.extract_strided_slice %156 {offsets = [0, 0], sizes = [8, 128], strides = [1, 1]} : vector<8x384xf32> to vector<8x128xf32>
    %160 = vector.extract_strided_slice %156 {offsets = [0, 128], sizes = [8, 128], strides = [1, 1]} : vector<8x384xf32> to vector<8x128xf32>
    %161 = vector.extract_strided_slice %156 {offsets = [0, 256], sizes = [8, 128], strides = [1, 1]} : vector<8x384xf32> to vector<8x128xf32>
    %162 = arith.mulf %160, %142 : vector<8x128xf32>
    %163 = arith.mulf %159, %158 : vector<8x128xf32>
    %164 = arith.addf %162, %163 : vector<8x128xf32>
    %165 = math.tanh %164 : vector<8x128xf32>
    %166 = arith.mulf %161, %165 : vector<8x128xf32>
    %c7_i32 = arith.constant 7 : i32
    %c8_i32_42 = arith.constant 8 : i32
    %167 = arith.muli %c7_i32, %c8_i32_42 : i32
    %168 = tpu.assume_multiple %167, 8 : i32
    %169 = arith.index_cast %168 : i32 to index
    %c0_43 = arith.constant 0 : index
    %170 = vector.load %arg7[%169, %c0_43] : memref<64x512xf32, #tpu.memory_space<vmem>>, vector<8x512xf32>
    %cst_44 = arith.constant dense<0.000000e+00> : vector<8x512xf32>
    %171 = tpu.matmul %166, %10, %cst_44 {dimension_numbers = #tpu.dot_dimension_numbers<[1], [0], [0], [1], [0, 0, 1, 1], [], []>} : vector<8x128xf32>, vector<128x512xf32>, vector<8x512xf32> -> vector<8x512xf32>
    %172 = arith.addf %170, %171 : vector<8x512xf32>
    %173 = vector.extract_strided_slice %172 {offsets = [0, 0], sizes = [8, 384], strides = [1, 1]} : vector<8x512xf32> to vector<8x384xf32>
    %174 = arith.negf %173 : vector<8x384xf32>
    %175 = math.exp %174 : vector<8x384xf32>
    %cst_45 = arith.constant 1.000000e+00 : f32
    %176 = vector.broadcast %cst_45 : f32 to vector<8x384xf32>
    %177 = arith.addf %176, %175 : vector<8x384xf32>
    %178 = arith.divf %176, %177 : vector<8x384xf32>
    %179 = vector.extract_strided_slice %172 {offsets = [0, 384], sizes = [8, 128], strides = [1, 1]} : vector<8x512xf32> to vector<8x128xf32>
    %180 = math.tanh %179 : vector<8x128xf32>
    %181 = vector.extract_strided_slice %178 {offsets = [0, 0], sizes = [8, 128], strides = [1, 1]} : vector<8x384xf32> to vector<8x128xf32>
    %182 = vector.extract_strided_slice %178 {offsets = [0, 128], sizes = [8, 128], strides = [1, 1]} : vector<8x384xf32> to vector<8x128xf32>
    %183 = vector.extract_strided_slice %178 {offsets = [0, 256], sizes = [8, 128], strides = [1, 1]} : vector<8x384xf32> to vector<8x128xf32>
    %184 = arith.mulf %182, %164 : vector<8x128xf32>
    %185 = arith.mulf %181, %180 : vector<8x128xf32>
    %186 = arith.addf %184, %185 : vector<8x128xf32>
    %187 = math.tanh %186 : vector<8x128xf32>
    %188 = arith.mulf %183, %187 : vector<8x128xf32>
    %c8_i32_46 = arith.constant 8 : i32
    %c0_47 = arith.constant 0 : index
    %c0_48 = arith.constant 0 : index
    %189 = vector.load %arg8[%c0_47, %c0_48] : memref<8x128xf32, #tpu.memory_space<vmem>>, vector<8x128xf32>
    tpu.vector_store %arg8[%c0_47, %c0_48], %188 {strides = array<i32>} : memref<8x128xf32, #tpu.memory_space<vmem>>, vector<8x128xf32>,
    %c0_49 = arith.constant 0 : index
    %c0_50 = arith.constant 0 : index
    %190 = vector.load %arg9[%c0_49, %c0_50] : memref<8x128xf32, #tpu.memory_space<vmem>>, vector<8x128xf32>
    tpu.vector_store %arg9[%c0_49, %c0_50], %186 {strides = array<i32>} : memref<8x128xf32, #tpu.memory_space<vmem>>, vector<8x128xf32>,
    %c0_i32_51 = arith.constant 0 : i32
    %191 = arith.cmpi eq, %arg0, %c0_i32_51 : i32
    %192 = arith.extui %191 : i1 to i32
    %c0_i32_52 = arith.constant 0 : i32
    %193 = arith.cmpi ne, %192, %c0_i32_52 : i32
    scf.if %193 {
      %c0_53 = arith.constant 0 : index
      %c0_54 = arith.constant 0 : index
      %c0_55 = arith.constant 0 : index
      %194 = vector.load %arg5[%c0_53, %c0_54, %c0_55] : memref<2x8x128xf32, #tpu.memory_space<vmem>>, vector<1x8x128xf32>
      %195 = vector.shape_cast %194 : vector<1x8x128xf32> to vector<8x128xf32>
      %196 = vector.shape_cast %188 : vector<8x128xf32> to vector<1x8x128xf32>
      tpu.vector_store %arg5[%c0_53, %c0_54, %c0_55], %196 {strides = array<i32>} : memref<2x8x128xf32, #tpu.memory_space<vmem>>, vector<1x8x128xf32>,
      %c1 = arith.constant 1 : index
      %c0_56 = arith.constant 0 : index
      %c0_57 = arith.constant 0 : index
      %197 = vector.load %arg5[%c1, %c0_56, %c0_57] : memref<2x8x128xf32, #tpu.memory_space<vmem>>, vector<1x8x128xf32>
      %198 = vector.shape_cast %197 : vector<1x8x128xf32> to vector<8x128xf32>
      %199 = vector.shape_cast %186 : vector<8x128xf32> to vector<1x8x128xf32>
      tpu.vector_store %arg5[%c1, %c0_56, %c0_57], %199 {strides = array<i32>} : memref<2x8x128xf32, #tpu.memory_space<vmem>>, vector<1x8x128xf32>,
    } else {
    }
    return
  }
  func.func @transform_0(%arg0: i32) -> (i32, i32) {
    %c0_i32 = arith.constant 0 : i32
    %c0_i32_0 = arith.constant 0 : i32
    return %arg0, %c0_i32 : i32, i32
  }
  func.func @transform_1(%arg0: i32) -> (i32, i32) {
    %c0_i32 = arith.constant 0 : i32
    %c0_i32_0 = arith.constant 0 : i32
    %c0_i32_1 = arith.constant 0 : i32
    return %c0_i32, %c0_i32_0 : i32, i32
  }
  func.func @transform_2(%arg0: i32) -> (i32, i32) {
    %c0_i32 = arith.constant 0 : i32
    %c0_i32_0 = arith.constant 0 : i32
    %c0_i32_1 = arith.constant 0 : i32
    return %c0_i32, %c0_i32_0 : i32, i32
  }
  func.func @transform_4(%arg0: i32) -> (i32, i32, i32) {
    %c0_i32 = arith.constant 0 : i32
    %c0_i32_0 = arith.constant 0 : i32
    %c0_i32_1 = arith.constant 0 : i32
    %c0_i32_2 = arith.constant 0 : i32
    return %c0_i32, %c0_i32_0, %c0_i32_1 : i32, i32, i32
  }
}

</mosaic_0001>

<bundles_post_ra>
// kernel: tpu_custom_call.1
= control target key start
LH: loop header
LB: loop body
LE: loop exit
PB: predicated region body
PF: predicated region fallthrough
CT: control target
= control target key end

     0   :  { %9 = vsyncpa [#allocation8], 0  ;;  %s2159_s15 = smov [#allocation2]   ;;  %s3204_s0 = inlined_call_operand.vmem [shape: f32[64,16], index: 0, kind: input, shape index: {}]   ;;  %s3205_s1 = inlined_call_operand.vmem [shape: f32[16,512], index: 1, kind: input, shape index: {}]   ;;  %s3206_s2 = inlined_call_operand.vmem [shape: f32[1,512], index: 2, kind: input, shape index: {}]   ;;  %s3207_s3 = inlined_call_operand.hbm [shape: f32[128,512], index: 3, kind: input, shape index: {}]   ;;  %s3208_s4 = inlined_call_operand.hbm [shape: f32[2,8,128], index: 4, kind: output, shape index: {}]  }
   0x1   :  { %s27_s16 = sshll.u32 %s2159_s15, 4  ;;  %s28_s16 = int_to_ptr.vmem [resolvable:$true] %s27_s16 }
   0x2   :  { %s2123_s17 = scalar_lea.vmem %s28_s16, 8192  ;;  %p2128_p1 = scmp.lt.s32.totalorder %s28_s16, %s28_s16 }
   0x3   :  { %p2124_p0 = scmp.ne.s32.totalorder %s28_s16, %s2123_s17  ;;  %p2129_p2 = scmp.lt.s32.totalorder %s2123_s17, %s2123_s17 }
   0x5   :  { %p2130_p3 = por %p2129_p2, %p2128_p1 }
   0x7   :  { %p2131_p4 = pnand %p2130_p3, %p2124_p0 }
   0x9   :  { %2134 = shalt.err (!%p2131_p4)  }
   0xa   :  { %30 = dma.hbm_to_vmem [thread:$0]  %s3207_s3, 8192, %s28_s16, [#allocation6] }
   0xb   :  { %2155 = dma.done.wait [#allocation6], 8192 }
   0xc   :  { %2156 = vsyncadd [#allocation6], 4294959104  ;;  %v3209_v0 = vmov 0.0   ;;  %v50_v1 = vld [vmem:[%s3205_s1 + $0x28] sm:$0xff]  ;;  %v52_v2 = vld [vmem:[%s3205_s1 + $0x38] sm:$0xff]  ;;  %vm75_vm0 = vcmask 130048  }
   0xd   :  { %164 = vmatprep.mubr.f32.mxu0 %v3209_v0  ;;  %277 = vmatprep.mubr.f32.mxu1 %v3209_v0  ;;  %v49_v3 = vld [vmem:[%s3205_s1 + $0x20] sm:$0xff]  ;;  %v51_v4 = vld [vmem:[%s3205_s1 + $0x30] sm:$0xff]  ;;  %v46_v5 = vld [vmem:[%s3205_s1 + $0x8] sm:$0xff] }
   0xe   :  { %128 = vmatprep.subr.mxu0 %v50_v1  ;;  %241 = vmatprep.subr.mxu1 %v52_v2  ;;  %v48_v6 = vld [vmem:[%s3205_s1 + $0x18] sm:$0xff]  ;;  %v45_v7 = vld [vmem:[%s3205_s1] sm:$0xff]  ;;  %v47_v8 = vld [vmem:[%s3205_s1 + $0x10] sm:$0xff] }
   0xf   :  { %129 = vmatpush1.msra.mxu0 %v49_v3  ;;  %242 = vmatpush1.msra.mxu1 %v51_v4  ;;  %v37_v9 = vld [vmem:[%s3204_s0] sm:$0xff]  ;;  %v2221_v10 = vld [vmem:[#allocation2 + $0x1e8] sm:$0xff]  ;;  %v2223_v11 = vld [vmem:[#allocation2 + $0x1f8] sm:$0xff] }
  0x10   :  { %130 = vmatprep.subr.mxu0 %v46_v5  ;;  %243 = vmatprep.subr.mxu1 %v48_v6  ;;  %3297 = vst [vmem:[#allocation15_spill] sm:$0xff] %v2221_v10  ;;  %3298 = vst [vmem:[#allocation16_spill] sm:$0xff] %v2223_v11  ;;  %v2225_v12 = vld [vmem:[#allocation2 + $0x1e0] sm:$0xff]  ;;  %v2227_v13 = vld [vmem:[#allocation2 + $0x1f0] sm:$0xff] }
  0x11   :  { %131 = vmatpush1.msra.mxu0 %v45_v7  ;;  %244 = vmatpush1.msra.mxu1 %v47_v8  ;;  %v2231_v14 = vld [vmem:[#allocation2 + $0x1c8] sm:$0xff]  ;;  %v2233_v15 = vld [vmem:[#allocation2 + $0x1d8] sm:$0xff]  ;;  %v2239_v16 = vld [vmem:[#allocation2 + $0x1c0] sm:$0xff] }
  0x12   :  { %1877 = vmatmul.mubr.msk.f32.vlgmr.msra.gmra.mxu0 %vm75_vm0, %v37_v9  ;;  %1885 = vmatmul.mubr.msk.f32.vlgmr.msra.gmra.mxu1 %vm75_vm0, %v37_v9  ;;  %v2241_v17 = vld [vmem:[#allocation2 + $0x1d0] sm:$0xff]  ;;  %v38_v18 = vld [vmem:[%s3204_s0 + $0x8] sm:$0xff]  ;;  %v2252_v20 = vld [vmem:[#allocation2 + $0x1b8] sm:$0xff] }
  0x13   :  { %431 = vmatprep.subr.mxu0 %v2221_v10  ;;  %502 = vmatprep.subr.mxu1 %v2223_v11  ;;  %v2250_v19 = vld [vmem:[#allocation2 + $0x1a8] sm:$0xff]  ;;  %v2256_v21 = vld [vmem:[#allocation2 + $0x1a0] sm:$0xff]  ;;  %v2258_v22 = vld [vmem:[#allocation2 + $0x1b0] sm:$0xff] }
  0x14   :  { %432 = vmatpush1.msra.mxu0 %v2225_v12  ;;  %503 = vmatpush1.msra.mxu1 %v2227_v13  ;;  %v2262_v23 = vld [vmem:[#allocation2 + $0x188] sm:$0xff]  ;;  %v2264_v24 = vld [vmem:[#allocation2 + $0x198] sm:$0xff]  ;;  %v2270_v25 = vld [vmem:[#allocation2 + $0x180] sm:$0xff] }
  0x15   :  { %433 = vmatprep.subr.mxu0 %v2231_v14  ;;  %504 = vmatprep.subr.mxu1 %v2233_v15  ;;  %v2272_v26 = vld [vmem:[#allocation2 + $0x190] sm:$0xff]  ;;  %v2281_v28 = vld [vmem:[#allocation2 + $0x168] sm:$0xff]  ;;  %v2283_v29 = vld [vmem:[#allocation2 + $0x178] sm:$0xff] }
  0x16   :  { %170 = vmatprep.mubr.f32.mxu0 %v3209_v0  ;;  %283 = vmatprep.mubr.f32.mxu1 %v3209_v0  ;;  %v39_v27 = vld [vmem:[%s3204_s0 + $0x10] sm:$0xff]  ;;  %v2287_v30 = vld [vmem:[#allocation2 + $0x160] sm:$0xff]  ;;  %v2293_v32 = vld [vmem:[#allocation2 + $0x148] sm:$0xff] }
  0x17   :  { %434 = vmatpush1.msra.mxu0 %v2239_v16  ;;  %505 = vmatpush1.msra.mxu1 %v2241_v17  ;;  %v2289_v31 = vld [vmem:[#allocation2 + $0x170] sm:$0xff]  ;;  %v2295_v33 = vld [vmem:[#allocation2 + $0x158] sm:$0xff]  ;;  %v2301_v34 = vld [vmem:[#allocation2 + $0x140] sm:$0xff] }
  0x18   :  { %1878 = vmatmul.mubr.msk.f32.gmra.mxu0 %vm75_vm0, %v38_v18  ;;  %1886 = vmatmul.mubr.msk.f32.gmra.mxu1 %vm75_vm0, %v38_v18  ;;  %v2303_v35 = vld [vmem:[#allocation2 + $0x150] sm:$0xff]  ;;  %v40_v36 = vld [vmem:[%s3204_s0 + $0x18] sm:$0xff]  ;;  %v2312_v37 = vld [vmem:[#allocation2 + $0x128] sm:$0xff] }
  0x19   :  { %435 = vmatprep.subr.mxu0 %v2250_v19  ;;  %506 = vmatprep.subr.mxu1 %v2252_v20  ;;  %v2314_v38 = vld [vmem:[#allocation2 + $0x138] sm:$0xff]  ;;  %v2318_v39 = vld [vmem:[#allocation2 + $0x120] sm:$0xff]  ;;  %v2320_v40 = vld [vmem:[#allocation2 + $0x130] sm:$0xff] }
  0x1a   :  { %436 = vmatpush1.msra.mxu0 %v2256_v21  ;;  %507 = vmatpush1.msra.mxu1 %v2258_v22  ;;  %v2324_v41 = vld [vmem:[#allocation2 + $0x108] sm:$0xff]  ;;  %v2326_v42 = vld [vmem:[#allocation2 + $0x118] sm:$0xff]  ;;  %v2332_v43 = vld [vmem:[#allocation2 + $0x100] sm:$0xff] }
  0x1b   :  { %437 = vmatprep.subr.mxu0 %v2262_v23  ;;  %508 = vmatprep.subr.mxu1 %v2264_v24  ;;  %v2334_v44 = vld [vmem:[#allocation2 + $0x110] sm:$0xff]  ;;  %v41_v45 = vld [vmem:[%s3204_s0 + $0x20] sm:$0xff]  ;;  %v2343_v46 = vld [vmem:[#allocation2 + $0xe8] sm:$0xff] }
  0x1c   :  { %176 = vmatprep.mubr.f32.mxu0 %v3209_v0  ;;  %289 = vmatprep.mubr.f32.mxu1 %v3209_v0  ;;  %v2345_v47 = vld [vmem:[#allocation2 + $0xf8] sm:$0xff]  ;;  %v2349_v48 = vld [vmem:[#allocation2 + $0xe0] sm:$0xff]  ;;  %v2351_v49 = vld [vmem:[#allocation2 + $0xf0] sm:$0xff] }
  0x1d   :  { %438 = vmatpush1.msra.mxu0 %v2270_v25  ;;  %509 = vmatpush1.msra.mxu1 %v2272_v26  ;;  %v2355_v50 = vld [vmem:[#allocation2 + $0xc8] sm:$0xff]  ;;  %v2357_v51 = vld [vmem:[#allocation2 + $0xd8] sm:$0xff]  ;;  %v2363_v52 = vld [vmem:[#allocation2 + $0xc0] sm:$0xff] }
  0x1e   :  { %1879 = vmatmul.mubr.msk.f32.gmra.mxu0 %vm75_vm0, %v39_v27  ;;  %1887 = vmatmul.mubr.msk.f32.gmra.mxu1 %vm75_vm0, %v39_v27  ;;  %v2365_v53 = vld [vmem:[#allocation2 + $0xd0] sm:$0xff]  ;;  %v42_v54 = vld [vmem:[%s3204_s0 + $0x28] sm:$0xff]  ;;  %v2376_v56 = vld [vmem:[#allocation2 + $0xb8] sm:$0xff] }
  0x1f   :  { %439 = vmatprep.subr.mxu0 %v2281_v28  ;;  %510 = vmatprep.subr.mxu1 %v2283_v29  ;;  %v2374_v55 = vld [vmem:[#allocation2 + $0xa8] sm:$0xff]  ;;  %v2380_v57 = vld [vmem:[#allocation2 + $0xa0] sm:$0xff]  ;;  %v2382_v58 = vld [vmem:[#allocation2 + $0xb0] sm:$0xff] }
  0x20   :  { %440 = vmatpush1.msra.mxu0 %v2287_v30  ;;  %511 = vmatpush1.msra.mxu1 %v2289_v31  ;;  %v2386_v59 = vld [vmem:[#allocation2 + $0x88] sm:$0xff]  ;;  %v2388_v60 = vld [vmem:[#allocation2 + $0x98] sm:$0xff]  ;;  %v2394_v61 = vld [vmem:[#allocation2 + $0x80] sm:$0xff] }
  0x21   :  { %441 = vmatprep.subr.mxu0 %v2293_v32  ;;  %512 = vmatprep.subr.mxu1 %v2295_v33  ;;  %3299 = vst [vmem:[#allocation17_spill] sm:$0xff] %v2386_v59  ;;  %3300 = vst [vmem:[#allocation18_spill] sm:$0xff] %v2388_v60  ;;  %v2396_v62 = vld [vmem:[#allocation2 + $0x90] sm:$0xff]  ;;  %v2405_v1 = vld [vmem:[#allocation2 + $0x68] sm:$0xff] }
  0x22   :  { %182 = vmatprep.mubr.f32.mxu0 %v3209_v0  ;;  %295 = vmatprep.mubr.f32.mxu1 %v3209_v0  ;;  %3301 = vst [vmem:[#allocation19_spill] sm:$0xff] %v2394_v61  ;;  %3302 = vst [vmem:[#allocation20_spill] sm:$0xff] %v2396_v62  ;;  %v43_v63 = vld [vmem:[%s3204_s0 + $0x30] sm:$0xff]  ;;  %v2407_v2 = vld [vmem:[#allocation2 + $0x78] sm:$0xff] }
  0x23   :  { %442 = vmatpush1.msra.mxu0 %v2301_v34  ;;  %513 = vmatpush1.msra.mxu1 %v2303_v35  ;;  %3303 = vst [vmem:[#allocation21_spill] sm:$0xff] %v2405_v1  ;;  %3304 = vst [vmem:[#allocation22_spill] sm:$0xff] %v2407_v2  ;;  %v2411_v3 = vld [vmem:[#allocation2 + $0x60] sm:$0xff]  ;;  %v2413_v4 = vld [vmem:[#allocation2 + $0x70] sm:$0xff] }
  0x24   :  { %1880 = vmatmul.mubr.msk.f32.gmra.mxu0 %vm75_vm0, %v40_v36  ;;  %1888 = vmatmul.mubr.msk.f32.gmra.mxu1 %vm75_vm0, %v40_v36  ;;  %3305 = vst [vmem:[#allocation23_spill] sm:$0xff] %v2411_v3  ;;  %3306 = vst [vmem:[#allocation24_spill] sm:$0xff] %v2413_v4  ;;  %v2417_v5 = vld [vmem:[#allocation2 + $0x48] sm:$0xff]  ;;  %v2419_v6 = vld [vmem:[#allocation2 + $0x58] sm:$0xff] }
  0x25   :  { %443 = vmatprep.subr.mxu0 %v2312_v37  ;;  %514 = vmatprep.subr.mxu1 %v2314_v38  ;;  %3307 = vst [vmem:[#allocation25_spill] sm:$0xff] %v2417_v5  ;;  %3308 = vst [vmem:[#allocation26_spill] sm:$0xff] %v2419_v6  ;;  %v2425_v7 = vld [vmem:[#allocation2 + $0x40] sm:$0xff]  ;;  %v2427_v8 = vld [vmem:[#allocation2 + $0x50] sm:$0xff] }
  0x26   :  { %444 = vmatpush1.msra.mxu0 %v2318_v39  ;;  %515 = vmatpush1.msra.mxu1 %v2320_v40  ;;  %3309 = vst [vmem:[#allocation27_spill] sm:$0xff] %v2425_v7  ;;  %3310 = vst [vmem:[#allocation28_spill] sm:$0xff] %v2427_v8  ;;  %v44_v9 = vld [vmem:[%s3204_s0 + $0x38] sm:$0xff]  ;;  %v2436_v18 = vld [vmem:[#allocation2 + $0x28] sm:$0xff] }
  0x27   :  { %445 = vmatprep.subr.mxu0 %v2324_v41  ;;  %516 = vmatprep.subr.mxu1 %v2326_v42  ;;  %3311 = vst [vmem:[#allocation29_spill] sm:$0xff] %v2436_v18  ;;  %v2438_v27 = vld [vmem:[#allocation2 + $0x38] sm:$0xff]  ;;  %v2442_v36 = vld [vmem:[#allocation2 + $0x20] sm:$0xff] }
  0x28   :  { %188 = vmatprep.mubr.f32.mxu0 %v3209_v0  ;;  %301 = vmatprep.mubr.f32.mxu1 %v3209_v0  ;;  %3312 = vst [vmem:[#allocation30_spill] sm:$0xff] %v2438_v27  ;;  %3313 = vst [vmem:[#allocation31_spill] sm:$0xff] %v2442_v36 }
  0x29   :  { %446 = vmatpush1.msra.mxu0 %v2332_v43  ;;  %517 = vmatpush1.msra.mxu1 %v2334_v44 }
  0x2a   :  { %1881 = vmatmul.mubr.msk.f32.gmra.mxu0 %vm75_vm0, %v41_v45  ;;  %1889 = vmatmul.mubr.msk.f32.gmra.mxu1 %vm75_vm0, %v41_v45  ;;  %v2444_v45 = vld [vmem:[#allocation2 + $0x30] sm:$0xff] }
  0x2b   :  { %447 = vmatprep.subr.mxu0 %v2343_v46  ;;  %518 = vmatprep.subr.mxu1 %v2345_v47  ;;  %3314 = vst [vmem:[#allocation32_spill] sm:$0xff] %v2444_v45 }
  0x2c   :  { %448 = vmatpush1.msra.mxu0 %v2349_v48  ;;  %519 = vmatpush1.msra.mxu1 %v2351_v49 }
  0x2d   :  { %449 = vmatprep.subr.mxu0 %v2355_v50  ;;  %520 = vmatprep.subr.mxu1 %v2357_v51 }
  0x2e   :  { %194 = vmatprep.mubr.f32.mxu0 %v3209_v0  ;;  %307 = vmatprep.mubr.f32.mxu1 %v3209_v0 }
  0x2f   :  { %450 = vmatpush1.msra.mxu0 %v2363_v52  ;;  %521 = vmatpush1.msra.mxu1 %v2365_v53 }
  0x30   :  { %1882 = vmatmul.mubr.msk.f32.gmra.mxu0 %vm75_vm0, %v42_v54  ;;  %1890 = vmatmul.mubr.msk.f32.gmra.mxu1 %vm75_vm0, %v42_v54  ;;  %v2448_v54 = vld [vmem:[#allocation2 + $0x8] sm:$0xff] }
  0x31   :  { %451 = vmatprep.subr.mxu0 %v2374_v55  ;;  %522 = vmatprep.subr.mxu1 %v2376_v56  ;;  %3315 = vst [vmem:[#allocation33_spill] sm:$0xff] %v2448_v54 }
  0x32   :  { %452 = vmatpush1.msra.mxu0 %v2380_v57  ;;  %523 = vmatpush1.msra.mxu1 %v2382_v58 }
  0x33   :  { %453 = vmatprep.subr.mxu0 %v2386_v59  ;;  %524 = vmatprep.subr.mxu1 %v2388_v60 }
  0x34   :  { %200 = vmatprep.mubr.f32.mxu0 %v3209_v0  ;;  %313 = vmatprep.mubr.f32.mxu1 %v3209_v0 }
  0x35   :  { %454 = vmatpush1.msra.mxu0 %v2394_v61  ;;  %525 = vmatpush1.msra.mxu1 %v2396_v62 }
  0x36   :  { %1883 = vmatmul.mubr.msk.f32.gmra.mxu0 %vm75_vm0, %v43_v63  ;;  %1891 = vmatmul.mubr.msk.f32.gmra.mxu1 %vm75_vm0, %v43_v63  ;;  %v2450_v63 = vld [vmem:[#allocation2 + $0x18] sm:$0xff] }
  0x37   :  { %455 = vmatprep.subr.mxu0 %v2405_v1  ;;  %526 = vmatprep.subr.mxu1 %v2407_v2  ;;  %3316 = vst [vmem:[#allocation34_spill] sm:$0xff] %v2450_v63 }
  0x38   :  { %456 = vmatpush1.msra.mxu0 %v2411_v3  ;;  %527 = vmatpush1.msra.mxu1 %v2413_v4 }
  0x39   :  { %457 = vmatprep.subr.mxu0 %v2417_v5  ;;  %528 = vmatprep.subr.mxu1 %v2419_v6 }
  0x3a   :  { %206 = vmatprep.mubr.f32.mxu0 %v3209_v0  ;;  %319 = vmatprep.mubr.f32.mxu1 %v3209_v0  ;;  %v2454_v0 = vld [vmem:[#allocation2] sm:$0xff] }
  0x3b   :  { %458 = vmatpush1.msra.mxu0 %v2425_v7  ;;  %529 = vmatpush1.msra.mxu1 %v2427_v8  ;;  %3317 = vst [vmem:[#allocation35_spill] sm:$0xff] %v2454_v0  ;;  %v2458_v8 = vld [vmem:[#allocation2 + $0x10] sm:$0xff] }
  0x3c   :  { %1884 = vmatmul.mubr.msk.f32.gmra.mxu0 %vm75_vm0, %v44_v9  ;;  %1892 = vmatmul.mubr.msk.f32.gmra.mxu1 %vm75_vm0, %v44_v9  ;;  %3318 = vst [vmem:[#allocation36_spill] sm:$0xff] %v2458_v8  ;;  %v3319_v9 = vmov 0.0  }
  0x3d   :  { %459 = vmatprep.subr.mxu0 %v2436_v18  ;;  %530 = vmatprep.subr.mxu1 %v2438_v27 }
  0x3e   :  { %460 = vmatpush1.msra.mxu0 %v2442_v36  ;;  %531 = vmatpush1.msra.mxu1 %v2444_v45 }
  0x3f   :  { %461 = vmatprep.subr.mxu0 %v2448_v54  ;;  %532 = vmatprep.subr.mxu1 %v2450_v63 }
  0x40   :  { %462 = vmatpush1.msra.mxu0 %v2454_v0  ;;  %495 = vmatprep.mubr.f32.mxu0 %v3319_v9 }
  0x41   :  { %533 = vmatpush1.msra.mxu1 %v2458_v8  ;;  %566 = vmatprep.mubr.f32.mxu1 %v3319_v9 }
  0x42   :  { %496 = vmatmul.mubr.f32.vlgmr.msra.gmra.mxu0 %v3319_v9  ;;  %567 = vmatmul.mubr.f32.vlgmr.msra.gmra.mxu1 %v3319_v9 }
  0x43   :  { %608 = vmatprep.subr.mxu0 %v2221_v10  ;;  %679 = vmatprep.subr.mxu1 %v2223_v11 }
  0x44   :  { %609 = vmatpush1.msra.mxu0 %v2225_v12  ;;  %680 = vmatpush1.msra.mxu1 %v2227_v13 }
  0x45   :  { %610 = vmatprep.subr.mxu0 %v2231_v14  ;;  %681 = vmatprep.subr.mxu1 %v2233_v15 }
  0x46   :  { %611 = vmatpush1.msra.mxu0 %v2239_v16  ;;  %682 = vmatpush1.msra.mxu1 %v2241_v17 }
  0x47   :  { %612 = vmatprep.subr.mxu0 %v2250_v19  ;;  %683 = vmatprep.subr.mxu1 %v2252_v20 }
  0x48   :  { %613 = vmatpush1.msra.mxu0 %v2256_v21  ;;  %684 = vmatpush1.msra.mxu1 %v2258_v22 }
  0x49   :  { %614 = vmatprep.subr.mxu0 %v2262_v23  ;;  %685 = vmatprep.subr.mxu1 %v2264_v24 }
  0x4a   :  { %615 = vmatpush1.msra.mxu0 %v2270_v25  ;;  %686 = vmatpush1.msra.mxu1 %v2272_v26 }
  0x4b   :  { %616 = vmatprep.subr.mxu0 %v2281_v28  ;;  %687 = vmatprep.subr.mxu1 %v2283_v29 }
  0x4c   :  { %617 = vmatpush1.msra.mxu0 %v2287_v30  ;;  %688 = vmatpush1.msra.mxu1 %v2289_v31 }
  0x4d   :  { %618 = vmatprep.subr.mxu0 %v2293_v32  ;;  %689 = vmatprep.subr.mxu1 %v2295_v33 }
  0x4e   :  { %619 = vmatpush1.msra.mxu0 %v2301_v34  ;;  %690 = vmatpush1.msra.mxu1 %v2303_v35 }
  0x4f   :  { %620 = vmatprep.subr.mxu0 %v2312_v37  ;;  %691 = vmatprep.subr.mxu1 %v2314_v38 }
  0x50   :  { %621 = vmatpush1.msra.mxu0 %v2318_v39  ;;  %692 = vmatpush1.msra.mxu1 %v2320_v40 }
  0x51   :  { %622 = vmatprep.subr.mxu0 %v2324_v41  ;;  %693 = vmatprep.subr.mxu1 %v2326_v42 }
  0x52   :  { %623 = vmatpush1.msra.mxu0 %v2332_v43  ;;  %694 = vmatpush1.msra.mxu1 %v2334_v44 }
  0x53   :  { %624 = vmatprep.subr.mxu0 %v2343_v46  ;;  %695 = vmatprep.subr.mxu1 %v2345_v47 }
  0x54   :  { %625 = vmatpush1.msra.mxu0 %v2349_v48  ;;  %696 = vmatpush1.msra.mxu1 %v2351_v49 }
  0x55   :  { %626 = vmatprep.subr.mxu0 %v2355_v50  ;;  %697 = vmatprep.subr.mxu1 %v2357_v51 }
  0x56   :  { %627 = vmatpush1.msra.mxu0 %v2363_v52  ;;  %698 = vmatpush1.msra.mxu1 %v2365_v53 }
  0x57   :  { %628 = vmatprep.subr.mxu0 %v2374_v55  ;;  %699 = vmatprep.subr.mxu1 %v2376_v56 }
  0x58   :  { %629 = vmatpush1.msra.mxu0 %v2380_v57  ;;  %700 = vmatpush1.msra.mxu1 %v2382_v58 }
  0x59   :  { %630 = vmatprep.subr.mxu0 %v2386_v59  ;;  %701 = vmatprep.subr.mxu1 %v2388_v60  ;;  %v3320_v59 = vld [vmem:[#allocation28_spill] sm:$0xff] }
  0x5a   :  { %631 = vmatpush1.msra.mxu0 %v2394_v61  ;;  %702 = vmatpush1.msra.mxu1 %v2396_v62 }
  0x5b   :  { %632 = vmatprep.subr.mxu0 %v2405_v1  ;;  %703 = vmatprep.subr.mxu1 %v2407_v2 }
  0x5c   :  { %633 = vmatpush1.msra.mxu0 %v2411_v3  ;;  %704 = vmatpush1.msra.mxu1 %v2413_v4 }
  0x5d   :  { %634 = vmatprep.subr.mxu0 %v2417_v5  ;;  %705 = vmatprep.subr.mxu1 %v2419_v6 }
  0x5e   :  { %635 = vmatpush1.msra.mxu0 %v2425_v7  ;;  %706 = vmatpush1.msra.mxu1 %v3320_v59 }
  0x5f   :  { %636 = vmatprep.subr.mxu0 %v2436_v18  ;;  %707 = vmatprep.subr.mxu1 %v2438_v27  ;;  %v55_v27 = vlaneseq }
  0x60   :  { %637 = vmatpush1.msra.mxu0 %v2442_v36  ;;  %708 = vmatpush1.msra.mxu1 %v2444_v45 }
  0x61   :  { %638 = vmatprep.subr.mxu0 %v2448_v54  ;;  %709 = vmatprep.subr.mxu1 %v2450_v63  ;;  %v56_v36 = vshrl.u32 %v55_v27, 7 }
  0x62   :  { %639 = vmatpush1.msra.mxu0 %v2454_v0  ;;  %672 = vmatprep.mubr.f32.mxu0 %v3319_v9  ;;  %v53_v0 = vld [vmem:[%s3206_s2] sm:$0xf]  ;;  %s2161_s2 = smov [#allocation7]  }
  0x63   :  { %710 = vmatpush1.msra.mxu1 %v2458_v8  ;;  %743 = vmatprep.mubr.f32.mxu1 %v3319_v9  ;;  %v57_v54 = vsub.s32 0, %v56_v36  ;;  %v65_v63 = vsub.s32 2, %v56_v36  ;;  %v61_v9 = vsub.s32 1, %v56_v36  ;;  %s1853_s25 = sshll.u32 %s2161_s2, 4  ;;  %s1854_s25 = int_to_ptr.vmem [resolvable:$true] %s1853_s25 }
  0x64   :  { %785 = vmatprep.subr.mxu0 %v2221_v10  ;;  %856 = vmatprep.subr.mxu1 %v2223_v11  ;;  %v69_v10 = vsub.s32 3, %v56_v36  ;;  %s2135_s3 = scalar_lea.vmem %s1854_s25, 256  ;;  %p2140_p6 = scmp.lt.s32.totalorder %s1854_s25, %s1854_s25 }
  0x65   :  { %v58_v7 = vrot.slane %v53_v0, %v57_v54  ;;  %v2547_v11 = vrot.slane %v53_v0, %v65_v63  ;;  %v62_v5 = vrot.slane %v53_v0, %v61_v9  ;;  %p2136_p5 = scmp.ne.s32.totalorder %s1854_s25, %s2135_s3  ;;  %p2141_p7 = scmp.lt.s32.totalorder %s2135_s3, %s2135_s3 }
  0x66   :  { %v2549_v4 = vrot.slane %v53_v0, %v69_v10 }
  0x67   :  { %p2142_p8 = por %p2141_p7, %p2140_p6 }
  0x69   :  { %p2143_p9 = pnand %p2142_p8, %p2136_p5 }
  0xd2   :  { %v2536_v18 = vpop.f32.mrf.mxu0  ;;  %v2538_v45 = vpop.f32.mrf.mxu1 }
  0xd4   :  { %v2543_v59 = vpop.f32.mrf.mxu0  ;;  %v2545_v8 = vpop.f32.mrf.mxu1 }
  0xd8   :  { %v172_v27 = vpop.f32.mrf.mxu0  ;;  %v285_v6 = vpop.f32.mrf.mxu1 }
  0xd9   :  { %v2551_v3 = vadd.f32 %v172_v27, %v58_v7  ;;  %v2554_v2 = vadd.f32 %v285_v6, %v2547_v11 }
  0xda   :  { %v174_v1 = vpop.f32.mrf.mxu0  ;;  %v287_v62 = vpop.f32.mrf.mxu1 }
  0xdb   :  { %3321 = vst [vmem:[#allocation37_spill] sm:$0xff] %v2551_v3  ;;  %3322 = vst [vmem:[#allocation38_spill] sm:$0xff] %v2554_v2  ;;  %v2556_v61 = vadd.f32 %v174_v1, %v62_v5  ;;  %v2559_v60 = vadd.f32 %v287_v62, %v2549_v4 }
  0xdd   :  { %3323 = vst [vmem:[#allocation39_spill] sm:$0xff] %v2556_v61  ;;  %3324 = vst [vmem:[#allocation40_spill] sm:$0xff] %v2559_v60 }
  0xde   :  { %v178_v36 = vpop.f32.mrf.mxu0  ;;  %v291_v54 = vpop.f32.mrf.mxu1 }
  0xdf   :  { %v2561_v63 = vadd.f32 %v178_v36, %v58_v7  ;;  %v2564_v9 = vadd.f32 %v291_v54, %v2547_v11 }
  0xe0   :  { %v180_v0 = vpop.f32.mrf.mxu0  ;;  %v293_v10 = vpop.f32.mrf.mxu1 }
  0xe1   :  { %3325 = vst [vmem:[#allocation41_spill] sm:$0xff] %v2561_v63  ;;  %3326 = vst [vmem:[#allocation42_spill] sm:$0xff] %v2564_v9  ;;  %v2566_v27 = vadd.f32 %v180_v0, %v62_v5  ;;  %v2569_v6 = vadd.f32 %v293_v10, %v2549_v4 }
  0xe3   :  { %3327 = vst [vmem:[#allocation43_spill] sm:$0xff] %v2566_v27  ;;  %3328 = vst [vmem:[#allocation44_spill] sm:$0xff] %v2569_v6 }
  0xe4   :  { %v184_v2 = vpop.f32.mrf.mxu0  ;;  %v297_v1 = vpop.f32.mrf.mxu1 }
  0xe5   :  { %v2571_v61 = vadd.f32 %v184_v2, %v58_v7  ;;  %v2574_v62 = vadd.f32 %v297_v1, %v2547_v11 }
  0xe6   :  { %v186_v60 = vpop.f32.mrf.mxu0  ;;  %v299_v36 = vpop.f32.mrf.mxu1 }
  0xe7   :  { %3329 = vst [vmem:[#allocation45_spill] sm:$0xff] %v2571_v61  ;;  %3330 = vst [vmem:[#allocation46_spill] sm:$0xff] %v2574_v62  ;;  %v2576_v63 = vadd.f32 %v186_v60, %v62_v5  ;;  %v2579_v54 = vadd.f32 %v299_v36, %v2549_v4 }
  0xe9   :  { %3331 = vst [vmem:[#allocation47_spill] sm:$0xff] %v2576_v63  ;;  %3332 = vst [vmem:[#allocation48_spill] sm:$0xff] %v2579_v54 }
  0xea   :  { %v190_v9 = vpop.f32.mrf.mxu0  ;;  %v303_v0 = vpop.f32.mrf.mxu1 }
  0xeb   :  { %v2581_v27 = vadd.f32 %v190_v9, %v58_v7  ;;  %v2584_v10 = vadd.f32 %v303_v0, %v2547_v11 }
  0xec   :  { %v192_v6 = vpop.f32.mrf.mxu0  ;;  %v305_v2 = vpop.f32.mrf.mxu1 }
  0xed   :  { %3333 = vst [vmem:[#allocation49_spill] sm:$0xff] %v2581_v27  ;;  %3334 = vst [vmem:[#allocation50_spill] sm:$0xff] %v2584_v10  ;;  %v2586_v61 = vadd.f32 %v192_v6, %v62_v5  ;;  %v2589_v1 = vadd.f32 %v305_v2, %v2549_v4 }
  0xef   :  { %3335 = vst [vmem:[#allocation51_spill] sm:$0xff] %v2586_v61  ;;  %3336 = vst [vmem:[#allocation52_spill] sm:$0xff] %v2589_v1 }
  0xf0   :  { %v196_v62 = vpop.f32.mrf.mxu0  ;;  %v309_v60 = vpop.f32.mrf.mxu1 }
  0xf1   :  { %v2591_v63 = vadd.f32 %v196_v62, %v58_v7  ;;  %v2594_v36 = vadd.f32 %v309_v60, %v2547_v11 }
  0xf2   :  { %v198_v54 = vpop.f32.mrf.mxu0  ;;  %v311_v9 = vpop.f32.mrf.mxu1 }
  0xf3   :  { %3337 = vst [vmem:[#allocation53_spill] sm:$0xff] %v2591_v63  ;;  %3338 = vst [vmem:[#allocation54_spill] sm:$0xff] %v2594_v36  ;;  %v2596_v27 = vadd.f32 %v198_v54, %v62_v5  ;;  %v2599_v0 = vadd.f32 %v311_v9, %v2549_v4 }
  0xf5   :  { %3339 = vst [vmem:[#allocation55_spill] sm:$0xff] %v2596_v27  ;;  %3340 = vst [vmem:[#allocation56_spill] sm:$0xff] %v2599_v0 }
  0xf6   :  { %v202_v10 = vpop.f32.mrf.mxu0  ;;  %v315_v6 = vpop.f32.mrf.mxu1 }
  0xf7   :  { %v2601_v61 = vadd.f32 %v202_v10, %v58_v7  ;;  %v2604_v2 = vadd.f32 %v315_v6, %v2547_v11 }
  0xf8   :  { %v204_v1 = vpop.f32.mrf.mxu0  ;;  %v317_v62 = vpop.f32.mrf.mxu1 }
  0xf9   :  { %3341 = vst [vmem:[#allocation57_spill] sm:$0xff] %v2601_v61  ;;  %3342 = vst [vmem:[#allocation58_spill] sm:$0xff] %v2604_v2  ;;  %v2606_v63 = vadd.f32 %v204_v1, %v62_v5  ;;  %v2609_v60 = vadd.f32 %v317_v62, %v2549_v4  ;;  %v167_v1 = vadd.f32 %v2536_v18, %v58_v7 }
  0xfa   :  { %v169_v62 = vadd.f32 %v2543_v59, %v62_v5 }
  0xfb   :  { %3343 = vst [vmem:[#allocation59_spill] sm:$0xff] %v2606_v63  ;;  %3344 = vst [vmem:[#allocation60_spill] sm:$0xff] %v2609_v60 }
  0xfc   :  { %v208_v36 = vpop.f32.mrf.mxu0  ;;  %v321_v54 = vpop.f32.mrf.mxu1 }
  0xfd   :  { %v2611_v27 = vadd.f32 %v208_v36, %v58_v7  ;;  %v2614_v9 = vadd.f32 %v321_v54, %v2547_v11 }
  0xfe   :  { %v210_v0 = vpop.f32.mrf.mxu0  ;;  %v323_v10 = vpop.f32.mrf.mxu1 }
  0xff   :  { %3345 = vst [vmem:[#allocation61_spill] sm:$0xff] %v2611_v27  ;;  %3346 = vst [vmem:[#allocation62_spill] sm:$0xff] %v2614_v9  ;;  %v2616_v61 = vadd.f32 %v210_v0, %v62_v5  ;;  %v2619_v6 = vadd.f32 %v323_v10, %v2549_v4  ;;  %v280_v0 = vadd.f32 %v2538_v45, %v2547_v11 }
 0x100   :  { %v282_v10 = vadd.f32 %v2545_v8, %v2549_v4 }
 0x101   :  { %3347 = vst [vmem:[#allocation63_spill] sm:$0xff] %v2616_v61  ;;  %3348 = vst [vmem:[#allocation64_spill] sm:$0xff] %v2619_v6 }
 0x102   :  { %v497_v2 = vpop.f32.mrf.mxu0  ;;  %v568_v54 = vpop.f32.mrf.mxu1 }
 0x103   :  { %v573_v60 = vadd.f32 %v497_v2, %v167_v1  ;;  %v575_v9 = vadd.f32 %v568_v54, %v280_v0  ;;  %v3352_v54 = vld [vmem:[#allocation20_spill] sm:$0xff]  ;;  %v3353_v0 = vld [vmem:[#allocation21_spill] sm:$0xff] }
 0x104   :  { %v499_v63 = vpop.f32.mrf.mxu0  ;;  %v570_v61 = vpop.f32.mrf.mxu1 }
 0x105   :  { %v1893_v3 = vmul.f32 -1.442695, %v573_v60  ;;  %v574_v36 = vadd.f32 %v499_v63, %v169_v62  ;;  %v1895_v7 = vmul.f32 -1.442695, %v575_v9  ;;  %v576_v6 = vadd.f32 %v570_v61, %v282_v10  ;;  %v3349_v9 = vld [vmem:[#allocation17_spill] sm:$0xff]  ;;  %v3354_v10 = vld [vmem:[#allocation22_spill] sm:$0xff] }
 0x107   :  { %1923 = vpow2.f32 %v1893_v3  ;;  %v1894_v27 = vmul.f32 -1.442695, %v574_v36  ;;  %v3351_v36 = vld [vmem:[#allocation19_spill] sm:$0xff] }
 0x109   :  { %1925 = vpow2.f32 %v1894_v27 }
 0x10a   :  { %1927 = vpow2.f32 %v1895_v7  ;;  %v3355_v7 = vld [vmem:[#allocation23_spill] sm:$0xff] }
 0x114   :  { %v1924_v18 = vpop.eup %1923 }
 0x115   :  { %v586_v59 = vadd.f32 1.0, %v1924_v18  ;;  %v3356_v18 = vld [vmem:[#allocation24_spill] sm:$0xff] }
 0x116   :  { %v1926_v5 = vpop.eup %1925 }
 0x117   :  { %1929 = vrcp.f32 %v586_v59  ;;  %v587_v63 = vadd.f32 1.0, %v1926_v5  ;;  %v1928_v3 = vpop.eup %1927  ;;  %v3357_v59 = vld [vmem:[#allocation25_spill] sm:$0xff]  ;;  %v3358_v5 = vld [vmem:[#allocation26_spill] sm:$0xff] }
 0x118   :  { %1931 = vtanh.f32 %v576_v6  ;;  %v588_v11 = vadd.f32 1.0, %v1928_v3  ;;  %v3350_v6 = vld [vmem:[#allocation18_spill] sm:$0xff]  ;;  %v3360_v3 = vld [vmem:[#allocation28_spill] sm:$0xff] }
 0x119   :  { %1933 = vrcp.f32 %v587_v63  ;;  %v3359_v63 = vld [vmem:[#allocation27_spill] sm:$0xff] }
 0x11a   :  { %1935 = vrcp.f32 %v588_v11  ;;  %v3364_v11 = vld [vmem:[#allocation32_spill] sm:$0xff] }
 0x124   :  { %v1930_v27 = vpop.eup %1929 }
 0x125   :  { %v1932_v2 = vpop.eup %1931 }
 0x126   :  { %v1934_v60 = vpop.eup %1933  ;;  %v597_v1 = vmul.f32 %v1932_v2, %v1930_v27  ;;  %v3361_v27 = vld [vmem:[#allocation29_spill] sm:$0xff]  ;;  %v3362_v2 = vld [vmem:[#allocation30_spill] sm:$0xff] }
 0x127   :  { %v596_v45 = vmul.f32 0.0, %v1934_v60  ;;  %v1936_v61 = vpop.eup %1935  ;;  %v3363_v60 = vld [vmem:[#allocation31_spill] sm:$0xff] }
 0x129   :  { %v2627_v62 = vadd.f32 %v597_v1, %v596_v45  ;;  %v3365_v45 = vld [vmem:[#allocation33_spill] sm:$0xff]  ;;  %v3366_v1 = vld [vmem:[#allocation34_spill] sm:$0xff] }
 0x12b   :  { %1937 = vtanh.f32 %v2627_v62 }
 0x138   :  { %v1938_v4 = vpop.eup %1937 }
 0x139   :  { %v600_v8 = vmul.f32 %v1938_v4, %v1936_v61  ;;  %v3367_v61 = vld [vmem:[#allocation35_spill] sm:$0xff]  ;;  %v3368_v4 = vmov 0.0  }
 0x13b   :  { %673 = vmatmul.mubr.f32.vlgmr.msra.gmra.mxu0 %v600_v8  ;;  %744 = vmatmul.mubr.f32.vlgmr.msra.gmra.mxu1 %v600_v8  ;;  %v3369_v8 = vld [vmem:[#allocation36_spill] sm:$0xff] }
 0x13c   :  { %786 = vmatpush1.msra.mxu0 %v2225_v12  ;;  %857 = vmatpush1.msra.mxu1 %v2227_v13 }
 0x13d   :  { %787 = vmatprep.subr.mxu0 %v2231_v14  ;;  %858 = vmatprep.subr.mxu1 %v2233_v15 }
 0x13e   :  { %788 = vmatpush1.msra.mxu0 %v2239_v16  ;;  %859 = vmatpush1.msra.mxu1 %v2241_v17 }
 0x13f   :  { %789 = vmatprep.subr.mxu0 %v2250_v19  ;;  %860 = vmatprep.subr.mxu1 %v2252_v20 }
 0x140   :  { %790 = vmatpush1.msra.mxu0 %v2256_v21  ;;  %861 = vmatpush1.msra.mxu1 %v2258_v22 }
 0x141   :  { %791 = vmatprep.subr.mxu0 %v2262_v23  ;;  %862 = vmatprep.subr.mxu1 %v2264_v24 }
 0x142   :  { %792 = vmatpush1.msra.mxu0 %v2270_v25  ;;  %863 = vmatpush1.msra.mxu1 %v2272_v26 }
 0x143   :  { %793 = vmatprep.subr.mxu0 %v2281_v28  ;;  %864 = vmatprep.subr.mxu1 %v2283_v29 }
 0x144   :  { %794 = vmatpush1.msra.mxu0 %v2287_v30  ;;  %865 = vmatpush1.msra.mxu1 %v2289_v31 }
 0x145   :  { %795 = vmatprep.subr.mxu0 %v2293_v32  ;;  %866 = vmatprep.subr.mxu1 %v2295_v33 }
 0x146   :  { %796 = vmatpush1.msra.mxu0 %v2301_v34  ;;  %867 = vmatpush1.msra.mxu1 %v2303_v35 }
 0x147   :  { %797 = vmatprep.subr.mxu0 %v2312_v37  ;;  %868 = vmatprep.subr.mxu1 %v2314_v38 }
 0x148   :  { %798 = vmatpush1.msra.mxu0 %v2318_v39  ;;  %869 = vmatpush1.msra.mxu1 %v2320_v40 }
 0x149   :  { %799 = vmatprep.subr.mxu0 %v2324_v41  ;;  %870 = vmatprep.subr.mxu1 %v2326_v42 }
 0x14a   :  { %800 = vmatpush1.msra.mxu0 %v2332_v43  ;;  %871 = vmatpush1.msra.mxu1 %v2334_v44 }
 0x14b   :  { %801 = vmatprep.subr.mxu0 %v2343_v46  ;;  %872 = vmatprep.subr.mxu1 %v2345_v47 }
 0x14c   :  { %802 = vmatpush1.msra.mxu0 %v2349_v48  ;;  %873 = vmatpush1.msra.mxu1 %v2351_v49 }
 0x14d   :  { %803 = vmatprep.subr.mxu0 %v2355_v50  ;;  %874 = vmatprep.subr.mxu1 %v2357_v51 }
 0x14e   :  { %804 = vmatpush1.msra.mxu0 %v2363_v52  ;;  %875 = vmatpush1.msra.mxu1 %v2365_v53 }
 0x14f   :  { %805 = vmatprep.subr.mxu0 %v2374_v55  ;;  %876 = vmatprep.subr.mxu1 %v2376_v56 }
 0x150   :  { %806 = vmatpush1.msra.mxu0 %v2380_v57  ;;  %877 = vmatpush1.msra.mxu1 %v2382_v58 }
 0x151   :  { %807 = vmatprep.subr.mxu0 %v3349_v9  ;;  %878 = vmatprep.subr.mxu1 %v3350_v6 }
 0x152   :  { %808 = vmatpush1.msra.mxu0 %v3351_v36  ;;  %879 = vmatpush1.msra.mxu1 %v3352_v54 }
 0x153   :  { %809 = vmatprep.subr.mxu0 %v3353_v0  ;;  %880 = vmatprep.subr.mxu1 %v3354_v10 }
 0x154   :  { %810 = vmatpush1.msra.mxu0 %v3355_v7  ;;  %881 = vmatpush1.msra.mxu1 %v3356_v18  ;;  %v3374_v18 = vld [vmem:[#allocation38_spill] sm:$0xff] }
 0x155   :  { %811 = vmatprep.subr.mxu0 %v3357_v59  ;;  %882 = vmatprep.subr.mxu1 %v3358_v5 }
 0x156   :  { %812 = vmatpush1.msra.mxu0 %v3359_v63  ;;  %883 = vmatpush1.msra.mxu1 %v3360_v3  ;;  %v3370_v3 = vld [vmem:[#allocation15_spill] sm:$0xff] }
 0x157   :  { %813 = vmatprep.subr.mxu0 %v3361_v27  ;;  %884 = vmatprep.subr.mxu1 %v3362_v2  ;;  %v3371_v27 = vld [vmem:[#allocation16_spill] sm:$0xff] }
 0x158   :  { %814 = vmatpush1.msra.mxu0 %v3363_v60  ;;  %885 = vmatpush1.msra.mxu1 %v3364_v11  ;;  %v3372_v60 = vld [vmem:[#allocation37_spill] sm:$0xff] }
 0x159   :  { %815 = vmatprep.subr.mxu0 %v3365_v45  ;;  %886 = vmatprep.subr.mxu1 %v3366_v1  ;;  %v3373_v45 = vld [vmem:[#allocation39_spill] sm:$0xff] }
 0x15a   :  { %816 = vmatpush1.msra.mxu0 %v3367_v61  ;;  %849 = vmatprep.mubr.f32.mxu0 %v3368_v4 }
 0x15b   :  { %887 = vmatpush1.msra.mxu1 %v3369_v8  ;;  %920 = vmatprep.mubr.f32.mxu1 %v3368_v4  ;;  %v3375_v4 = vld [vmem:[#allocation40_spill] sm:$0xff] }
 0x15c   :  { %962 = vmatprep.subr.mxu0 %v3370_v3  ;;  %1033 = vmatprep.subr.mxu1 %v3371_v27 }
 0x1fb   :  { %v674_v2 = vpop.f32.mrf.mxu0  ;;  %v745_v61 = vpop.f32.mrf.mxu1 }
 0x1fc   :  { %v750_v63 = vadd.f32 %v674_v2, %v3372_v60  ;;  %v752_v7 = vadd.f32 %v745_v61, %v3374_v18 }
 0x1fd   :  { %v676_v11 = vpop.f32.mrf.mxu0  ;;  %v747_v8 = vpop.f32.mrf.mxu1 }
 0x1fe   :  { %v1896_v5 = vmul.f32 -1.442695, %v750_v63  ;;  %v751_v59 = vadd.f32 %v676_v11, %v3373_v45  ;;  %v1898_v10 = vmul.f32 -1.442695, %v752_v7  ;;  %v753_v0 = vadd.f32 %v747_v8, %v3375_v4 }
 0x200   :  { %1939 = vpow2.f32 %v1896_v5  ;;  %v1897_v1 = vmul.f32 -1.442695, %v751_v59 }
 0x202   :  { %1941 = vpow2.f32 %v1897_v1 }
 0x203   :  { %1943 = vpow2.f32 %v1898_v10 }
 0x204   :  { %1945 = vtanh.f32 %v753_v0 }
 0x20d   :  { %v1940_v3 = vpop.eup %1939 }
 0x20e   :  { %v763_v54 = vadd.f32 1.0, %v1940_v3  ;;  %v3398_v3 = vld [vmem:[#allocation42_spill] sm:$0xff] }
 0x20f   :  { %v1942_v27 = vpop.eup %1941 }
 0x210   :  { %1947 = vrcp.f32 %v763_v54  ;;  %v764_v2 = vadd.f32 1.0, %v1942_v27  ;;  %v1944_v63 = vpop.eup %1943  ;;  %v3397_v54 = vld [vmem:[#allocation43_spill] sm:$0xff] }
 0x211   :  { %v1946_v60 = vpop.eup %1945  ;;  %v765_v45 = vadd.f32 1.0, %v1944_v63 }
 0x212   :  { %1949 = vrcp.f32 %v764_v2 }
 0x213   :  { %1951 = vrcp.f32 %v765_v45 }
 0x21d   :  { %v1948_v5 = vpop.eup %1947 }
 0x21e   :  { %v774_v59 = vmul.f32 %v1948_v5, %v1946_v60  ;;  %v3399_v60 = vld [vmem:[#allocation44_spill] sm:$0xff] }
 0x21f   :  { %v1950_v11 = vpop.eup %1949 }
 0x220   :  { %v773_v18 = vmul.f32 %v1950_v11, %v2627_v62  ;;  %v1952_v7 = vpop.eup %1951 }
 0x222   :  { %v2701_v1 = vadd.f32 %v774_v59, %v773_v18 }
 0x224   :  { %1953 = vtanh.f32 %v2701_v1 }
 0x231   :  { %v1954_v10 = vpop.eup %1953 }
 0x232   :  { %v777_v61 = vmul.f32 %v1954_v10, %v1952_v7 }
 0x234   :  { %850 = vmatmul.mubr.f32.vlgmr.msra.gmra.mxu0 %v777_v61  ;;  %921 = vmatmul.mubr.f32.vlgmr.msra.gmra.mxu1 %v777_v61 }
 0x235   :  { %963 = vmatpush1.msra.mxu0 %v2225_v12  ;;  %1034 = vmatpush1.msra.mxu1 %v2227_v13  ;;  %v3376_v12 = vld [vmem:[#allocation20_spill] sm:$0xff]  ;;  %v3377_v13 = vld [vmem:[#allocation21_spill] sm:$0xff] }
 0x236   :  { %964 = vmatprep.subr.mxu0 %v2231_v14  ;;  %1035 = vmatprep.subr.mxu1 %v2233_v15  ;;  %v3378_v14 = vld [vmem:[#allocation22_spill] sm:$0xff]  ;;  %v3379_v15 = vld [vmem:[#allocation23_spill] sm:$0xff] }
 0x237   :  { %965 = vmatpush1.msra.mxu0 %v2239_v16  ;;  %1036 = vmatpush1.msra.mxu1 %v2241_v17  ;;  %v3380_v16 = vld [vmem:[#allocation24_spill] sm:$0xff]  ;;  %v3381_v17 = vld [vmem:[#allocation25_spill] sm:$0xff] }
 0x238   :  { %966 = vmatprep.subr.mxu0 %v2250_v19  ;;  %1037 = vmatprep.subr.mxu1 %v2252_v20  ;;  %v3382_v19 = vld [vmem:[#allocation26_spill] sm:$0xff]  ;;  %v3383_v20 = vld [vmem:[#allocation27_spill] sm:$0xff] }
 0x239   :  { %967 = vmatpush1.msra.mxu0 %v2256_v21  ;;  %1038 = vmatpush1.msra.mxu1 %v2258_v22  ;;  %v3384_v21 = vld [vmem:[#allocation28_spill] sm:$0xff]  ;;  %v3385_v22 = vld [vmem:[#allocation29_spill] sm:$0xff] }
 0x23a   :  { %968 = vmatprep.subr.mxu0 %v2262_v23  ;;  %1039 = vmatprep.subr.mxu1 %v2264_v24  ;;  %v3386_v23 = vld [vmem:[#allocation30_spill] sm:$0xff]  ;;  %v3387_v24 = vld [vmem:[#allocation31_spill] sm:$0xff] }
 0x23b   :  { %969 = vmatpush1.msra.mxu0 %v2270_v25  ;;  %1040 = vmatpush1.msra.mxu1 %v2272_v26  ;;  %v3388_v25 = vld [vmem:[#allocation32_spill] sm:$0xff]  ;;  %v3389_v26 = vld [vmem:[#allocation33_spill] sm:$0xff] }
 0x23c   :  { %970 = vmatprep.subr.mxu0 %v2281_v28  ;;  %1041 = vmatprep.subr.mxu1 %v2283_v29  ;;  %v3390_v28 = vld [vmem:[#allocation34_spill] sm:$0xff]  ;;  %v3391_v29 = vld [vmem:[#allocation35_spill] sm:$0xff] }
 0x23d   :  { %971 = vmatpush1.msra.mxu0 %v2287_v30  ;;  %1042 = vmatpush1.msra.mxu1 %v2289_v31  ;;  %v3392_v30 = vmov 0.0   ;;  %v3393_v31 = vld [vmem:[#allocation36_spill] sm:$0xff] }
 0x23e   :  { %972 = vmatprep.subr.mxu0 %v2293_v32  ;;  %1043 = vmatprep.subr.mxu1 %v2295_v33  ;;  %v2768_v32 = vld [vmem:[#allocation2 + $0x1e8] sm:$0xff]  ;;  %v2771_v33 = vld [vmem:[#allocation2 + $0x1f8] sm:$0xff] }
 0x23f   :  { %973 = vmatpush1.msra.mxu0 %v2301_v34  ;;  %1044 = vmatpush1.msra.mxu1 %v2303_v35  ;;  %3394 = vst [vmem:[#allocation17_spill] sm:$0xff] %v2768_v32  ;;  %3395 = vst [vmem:[#allocation18_spill] sm:$0xff] %v2771_v33  ;;  %v3396_v35 = vld [vmem:[#allocation41_spill] sm:$0xff] }
 0x240   :  { %974 = vmatprep.subr.mxu0 %v2312_v37  ;;  %1045 = vmatprep.subr.mxu1 %v2314_v38 }
 0x241   :  { %975 = vmatpush1.msra.mxu0 %v2318_v39  ;;  %1046 = vmatpush1.msra.mxu1 %v2320_v40 }
 0x242   :  { %976 = vmatprep.subr.mxu0 %v2324_v41  ;;  %1047 = vmatprep.subr.mxu1 %v2326_v42 }
 0x243   :  { %977 = vmatpush1.msra.mxu0 %v2332_v43  ;;  %1048 = vmatpush1.msra.mxu1 %v2334_v44 }
 0x244   :  { %978 = vmatprep.subr.mxu0 %v2343_v46  ;;  %1049 = vmatprep.subr.mxu1 %v2345_v47 }
 0x245   :  { %979 = vmatpush1.msra.mxu0 %v2349_v48  ;;  %1050 = vmatpush1.msra.mxu1 %v2351_v49 }
 0x246   :  { %980 = vmatprep.subr.mxu0 %v2355_v50  ;;  %1051 = vmatprep.subr.mxu1 %v2357_v51 }
 0x247   :  { %981 = vmatpush1.msra.mxu0 %v2363_v52  ;;  %1052 = vmatpush1.msra.mxu1 %v2365_v53 }
 0x248   :  { %982 = vmatprep.subr.mxu0 %v2374_v55  ;;  %1053 = vmatprep.subr.mxu1 %v2376_v56 }
 0x249   :  { %983 = vmatpush1.msra.mxu0 %v2380_v57  ;;  %1054 = vmatpush1.msra.mxu1 %v2382_v58 }
 0x24a   :  { %984 = vmatprep.subr.mxu0 %v3349_v9  ;;  %1055 = vmatprep.subr.mxu1 %v3350_v6 }
 0x24b   :  { %985 = vmatpush1.msra.mxu0 %v3351_v36  ;;  %1056 = vmatpush1.msra.mxu1 %v3376_v12 }
 0x24c   :  { %986 = vmatprep.subr.mxu0 %v3377_v13  ;;  %1057 = vmatprep.subr.mxu1 %v3378_v14 }
 0x24d   :  { %987 = vmatpush1.msra.mxu0 %v3379_v15  ;;  %1058 = vmatpush1.msra.mxu1 %v3380_v16 }
 0x24e   :  { %988 = vmatprep.subr.mxu0 %v3381_v17  ;;  %1059 = vmatprep.subr.mxu1 %v3382_v19 }
 0x24f   :  { %989 = vmatpush1.msra.mxu0 %v3383_v20  ;;  %1060 = vmatpush1.msra.mxu1 %v3384_v21 }
 0x250   :  { %990 = vmatprep.subr.mxu0 %v3385_v22  ;;  %1061 = vmatprep.subr.mxu1 %v3386_v23 }
 0x251   :  { %991 = vmatpush1.msra.mxu0 %v3387_v24  ;;  %1062 = vmatpush1.msra.mxu1 %v3388_v25 }
 0x252   :  { %992 = vmatprep.subr.mxu0 %v3389_v26  ;;  %1063 = vmatprep.subr.mxu1 %v3390_v28 }
 0x253   :  { %993 = vmatpush1.msra.mxu0 %v3391_v29  ;;  %1026 = vmatprep.mubr.f32.mxu0 %v3392_v30 }
 0x254   :  { %1064 = vmatpush1.msra.mxu1 %v3393_v31  ;;  %1097 = vmatprep.mubr.f32.mxu1 %v3392_v30 }
 0x255   :  { %1139 = vmatprep.subr.mxu0 %v2768_v32  ;;  %1210 = vmatprep.subr.mxu1 %v2771_v33 }
 0x2f4   :  { %v851_v34 = vpop.f32.mrf.mxu0  ;;  %v922_v8 = vpop.f32.mrf.mxu1 }
 0x2f5   :  { %v927_v37 = vadd.f32 %v851_v34, %v3396_v35  ;;  %v929_v27 = vadd.f32 %v922_v8, %v3398_v3  ;;  %v2782_v8 = vld [vmem:[#allocation2 + $0x1e0] sm:$0xff]  ;;  %v2785_v3 = vld [vmem:[#allocation2 + $0x1f0] sm:$0xff] }
 0x2f6   :  { %v853_v38 = vpop.f32.mrf.mxu0  ;;  %v924_v2 = vpop.f32.mrf.mxu1 }
 0x2f7   :  { %v1899_v62 = vmul.f32 -1.442695, %v927_v37  ;;  %v928_v0 = vadd.f32 %v853_v38, %v3397_v54  ;;  %v1901_v63 = vmul.f32 -1.442695, %v929_v27  ;;  %v930_v5 = vadd.f32 %v924_v2, %v3399_v60  ;;  %v2788_v27 = vld [vmem:[#allocation2 + $0x1c8] sm:$0xff]  ;;  %v2794_v2 = vld [vmem:[#allocation2 + $0x1c0] sm:$0xff] }
 0x2f8   :  { %v2800_v60 = vld [vmem:[#allocation2 + $0x1a8] sm:$0xff] }
 0x2f9   :  { %1955 = vpow2.f32 %v1899_v62  ;;  %v1900_v4 = vmul.f32 -1.442695, %v928_v0 }
 0x2fb   :  { %1957 = vpow2.f32 %v1900_v4 }
 0x2fc   :  { %1959 = vpow2.f32 %v1901_v63  ;;  %v2797_v63 = vld [vmem:[#allocation2 + $0x1d0] sm:$0xff] }
 0x2fd   :  { %1961 = vtanh.f32 %v930_v5  ;;  %v2803_v5 = vld [vmem:[#allocation2 + $0x1b8] sm:$0xff] }
 0x306   :  { %v1956_v59 = vpop.eup %1955 }
 0x307   :  { %v940_v11 = vadd.f32 1.0, %v1956_v59  ;;  %v2806_v59 = vld [vmem:[#allocation2 + $0x1a0] sm:$0xff] }
 0x308   :  { %v1958_v45 = vpop.eup %1957 }
 0x309   :  { %1963 = vrcp.f32 %v940_v11  ;;  %v941_v18 = vadd.f32 1.0, %v1958_v45  ;;  %v1960_v7 = vpop.eup %1959  ;;  %v2809_v11 = vld [vmem:[#allocation2 + $0x1b0] sm:$0xff]  ;;  %v2812_v45 = vld [vmem:[#allocation2 + $0x188] sm:$0xff] }
 0x30a   :  { %v1962_v10 = vpop.eup %1961  ;;  %v942_v37 = vadd.f32 1.0, %v1960_v7  ;;  %v2818_v7 = vld [vmem:[#allocation2 + $0x180] sm:$0xff] }
 0x30b   :  { %1965 = vrcp.f32 %v941_v18  ;;  %v2815_v18 = vld [vmem:[#allocation2 + $0x198] sm:$0xff] }
 0x30c   :  { %1967 = vrcp.f32 %v942_v37  ;;  %v2833_v37 = vld [vmem:[#allocation2 + $0x170] sm:$0xff] }
 0x30d   :  { %3401 = vst [vmem:[#allocation15_spill] sm:$0xff] %v2833_v37 }
 0x316   :  { %v1964_v61 = vpop.eup %1963 }
 0x317   :  { %v951_v34 = vmul.f32 %v1964_v61, %v1962_v10  ;;  %v2821_v10 = vld [vmem:[#allocation2 + $0x190] sm:$0xff]  ;;  %v2824_v61 = vld [vmem:[#allocation2 + $0x168] sm:$0xff] }
 0x318   :  { %v1966_v35 = vpop.eup %1965 }
 0x319   :  { %v950_v38 = vmul.f32 %v1966_v35, %v2701_v1  ;;  %v1968_v54 = vpop.eup %1967  ;;  %v2791_v1 = vld [vmem:[#allocation2 + $0x1d8] sm:$0xff]  ;;  %v2830_v35 = vld [vmem:[#allocation2 + $0x160] sm:$0xff] }
 0x31a   :  { %3400 = vst [vmem:[#allocation19_spill] sm:$0xff] %v2830_v35 }
 0x31b   :  { %v2779_v62 = vadd.f32 %v951_v34, %v950_v38  ;;  %v2827_v34 = vld [vmem:[#allocation2 + $0x178] sm:$0xff]  ;;  %v2836_v38 = vld [vmem:[#allocation2 + $0x148] sm:$0xff] }
 0x31d   :  { %1969 = vtanh.f32 %v2779_v62 }
 0x32a   :  { %v1970_v0 = vpop.eup %1969 }
 0x32b   :  { %v954_v4 = vmul.f32 %v1970_v0, %v1968_v54  ;;  %v2839_v54 = vld [vmem:[#allocation2 + $0x158] sm:$0xff]  ;;  %v2842_v0 = vld [vmem:[#allocation2 + $0x140] sm:$0xff] }
 0x32d   :  { %1027 = vmatmul.mubr.f32.vlgmr.msra.gmra.mxu0 %v954_v4  ;;  %1098 = vmatmul.mubr.f32.vlgmr.msra.gmra.mxu1 %v954_v4  ;;  %v2845_v4 = vld [vmem:[#allocation2 + $0x150] sm:$0xff] }
 0x32e   :  { %1140 = vmatpush1.msra.mxu0 %v2782_v8  ;;  %1211 = vmatpush1.msra.mxu1 %v2785_v3 }
 0x32f   :  { %1141 = vmatprep.subr.mxu0 %v2788_v27  ;;  %1212 = vmatprep.subr.mxu1 %v2791_v1 }
 0x330   :  { %1142 = vmatpush1.msra.mxu0 %v2794_v2  ;;  %1213 = vmatpush1.msra.mxu1 %v2797_v63 }
 0x331   :  { %1143 = vmatprep.subr.mxu0 %v2800_v60  ;;  %1214 = vmatprep.subr.mxu1 %v2803_v5 }
 0x332   :  { %1144 = vmatpush1.msra.mxu0 %v2806_v59  ;;  %1215 = vmatpush1.msra.mxu1 %v2809_v11 }
 0x333   :  { %1145 = vmatprep.subr.mxu0 %v2812_v45  ;;  %1216 = vmatprep.subr.mxu1 %v2815_v18 }
 0x334   :  { %1146 = vmatpush1.msra.mxu0 %v2818_v7  ;;  %1217 = vmatpush1.msra.mxu1 %v2821_v10 }
 0x335   :  { %1147 = vmatprep.subr.mxu0 %v2824_v61  ;;  %1218 = vmatprep.subr.mxu1 %v2827_v34 }
 0x336   :  { %1148 = vmatpush1.msra.mxu0 %v2830_v35  ;;  %1219 = vmatpush1.msra.mxu1 %v2833_v37  ;;  %v2848_v35 = vld [vmem:[#allocation2 + $0x128] sm:$0xff]  ;;  %v2851_v37 = vld [vmem:[#allocation2 + $0x138] sm:$0xff] }
 0x337   :  { %1149 = vmatprep.subr.mxu0 %v2836_v38  ;;  %1220 = vmatprep.subr.mxu1 %v2839_v54 }
 0x338   :  { %1150 = vmatpush1.msra.mxu0 %v2842_v0  ;;  %1221 = vmatpush1.msra.mxu1 %v2845_v4 }
 0x339   :  { %1151 = vmatprep.subr.mxu0 %v2848_v35  ;;  %1222 = vmatprep.subr.mxu1 %v2851_v37 }
 0x33a   :  { %1152 = vmatpush1.msra.mxu0 %v2318_v39  ;;  %1223 = vmatpush1.msra.mxu1 %v2320_v40  ;;  %v3402_v40 = vld [vmem:[#allocation45_spill] sm:$0xff] }
 0x33b   :  { %1153 = vmatprep.subr.mxu0 %v2324_v41  ;;  %1224 = vmatprep.subr.mxu1 %v2326_v42 }
 0x33c   :  { %1154 = vmatpush1.msra.mxu0 %v2332_v43  ;;  %1225 = vmatpush1.msra.mxu1 %v2334_v44  ;;  %v3403_v44 = vld [vmem:[#allocation47_spill] sm:$0xff] }
 0x33d   :  { %1155 = vmatprep.subr.mxu0 %v2343_v46  ;;  %1226 = vmatprep.subr.mxu1 %v2345_v47 }
 0x33e   :  { %1156 = vmatpush1.msra.mxu0 %v2349_v48  ;;  %1227 = vmatpush1.msra.mxu1 %v2351_v49  ;;  %v3404_v49 = vld [vmem:[#allocation46_spill] sm:$0xff] }
 0x33f   :  { %1157 = vmatprep.subr.mxu0 %v2355_v50  ;;  %1228 = vmatprep.subr.mxu1 %v2357_v51 }
 0x340   :  { %1158 = vmatpush1.msra.mxu0 %v2363_v52  ;;  %1229 = vmatpush1.msra.mxu1 %v2365_v53  ;;  %v3405_v53 = vld [vmem:[#allocation48_spill] sm:$0xff] }
 0x341   :  { %1159 = vmatprep.subr.mxu0 %v2374_v55  ;;  %1230 = vmatprep.subr.mxu1 %v2376_v56 }
 0x342   :  { %1160 = vmatpush1.msra.mxu0 %v2380_v57  ;;  %1231 = vmatpush1.msra.mxu1 %v2382_v58 }
 0x343   :  { %1161 = vmatprep.subr.mxu0 %v3349_v9  ;;  %1232 = vmatprep.subr.mxu1 %v3350_v6 }
 0x344   :  { %1162 = vmatpush1.msra.mxu0 %v3351_v36  ;;  %1233 = vmatpush1.msra.mxu1 %v3376_v12 }
 0x345   :  { %1163 = vmatprep.subr.mxu0 %v3377_v13  ;;  %1234 = vmatprep.subr.mxu1 %v3378_v14 }
 0x346   :  { %1164 = vmatpush1.msra.mxu0 %v3379_v15  ;;  %1235 = vmatpush1.msra.mxu1 %v3380_v16 }
 0x347   :  { %1165 = vmatprep.subr.mxu0 %v3381_v17  ;;  %1236 = vmatprep.subr.mxu1 %v3382_v19 }
 0x348   :  { %1166 = vmatpush1.msra.mxu0 %v3383_v20  ;;  %1237 = vmatpush1.msra.mxu1 %v3384_v21 }
 0x349   :  { %1167 = vmatprep.subr.mxu0 %v3385_v22  ;;  %1238 = vmatprep.subr.mxu1 %v3386_v23  ;;  %v3406_v22 = vld [vmem:[#allocation19_spill] sm:$0xff] }
 0x34a   :  { %1168 = vmatpush1.msra.mxu0 %v3387_v24  ;;  %1239 = vmatpush1.msra.mxu1 %v3388_v25  ;;  %v3407_v23 = vld [vmem:[#allocation15_spill] sm:$0xff]  ;;  %v2928_v24 = vld [vmem:[#allocation2 + $0x120] sm:$0xff] }
 0x34b   :  { %1169 = vmatprep.subr.mxu0 %v3389_v26  ;;  %1240 = vmatprep.subr.mxu1 %v3390_v28  ;;  %v2931_v25 = vld [vmem:[#allocation2 + $0x130] sm:$0xff]  ;;  %v2934_v26 = vld [vmem:[#allocation2 + $0x108] sm:$0xff]  ;;  %v2937_v28 = vld [vmem:[#allocation2 + $0x118] sm:$0xff] }
 0x34c   :  { %1170 = vmatpush1.msra.mxu0 %v3391_v29  ;;  %1203 = vmatprep.mubr.f32.mxu0 %v3392_v30  ;;  %v2940_v29 = vld [vmem:[#allocation2 + $0x100] sm:$0xff] }
 0x34d   :  { %1241 = vmatpush1.msra.mxu1 %v3393_v31  ;;  %1274 = vmatprep.mubr.f32.mxu1 %v3392_v30  ;;  %v2943_v31 = vld [vmem:[#allocation2 + $0x110] sm:$0xff] }
 0x34e   :  { %1316 = vmatprep.subr.mxu0 %v2768_v32  ;;  %1387 = vmatprep.subr.mxu1 %v2771_v33 }
 0x3ed   :  { %v1028_v39 = vpop.f32.mrf.mxu0  ;;  %v1099_v48 = vpop.f32.mrf.mxu1 }
 0x3ee   :  { %v1104_v41 = vadd.f32 %v1028_v39, %v3402_v40  ;;  %v1106_v50 = vadd.f32 %v1099_v48, %v3404_v49  ;;  %v2949_v39 = vld [vmem:[#allocation2 + $0xf8] sm:$0xff]  ;;  %v2952_v40 = vld [vmem:[#allocation2 + $0xe0] sm:$0xff] }
 0x3ef   :  { %v1030_v42 = vpop.f32.mrf.mxu0  ;;  %v1101_v51 = vpop.f32.mrf.mxu1  ;;  %v2973_v48 = vld [vmem:[#allocation2 + $0xb8] sm:$0xff]  ;;  %v2976_v49 = vld [vmem:[#allocation2 + $0xa0] sm:$0xff] }
 0x3f0   :  { %v1902_v43 = vmul.f32 -1.442695, %v1104_v41  ;;  %v1105_v46 = vadd.f32 %v1030_v42, %v3403_v44  ;;  %v1904_v52 = vmul.f32 -1.442695, %v1106_v50  ;;  %v1107_v55 = vadd.f32 %v1101_v51, %v3405_v53  ;;  %v2955_v41 = vld [vmem:[#allocation2 + $0xf0] sm:$0xff]  ;;  %v2958_v42 = vld [vmem:[#allocation2 + $0xc8] sm:$0xff] }
 0x3f1   :  { %v2964_v44 = vld [vmem:[#allocation2 + $0xc0] sm:$0xff]  ;;  %v2979_v50 = vld [vmem:[#allocation2 + $0xb0] sm:$0xff]  ;;  %v2982_v51 = vld [vmem:[#allocation2 + $0x88] sm:$0xff] }
 0x3f2   :  { %1971 = vpow2.f32 %v1902_v43  ;;  %v1903_v47 = vmul.f32 -1.442695, %v1105_v46  ;;  %v2961_v43 = vld [vmem:[#allocation2 + $0xd8] sm:$0xff]  ;;  %v2967_v46 = vld [vmem:[#allocation2 + $0xd0] sm:$0xff]  ;;  %v2988_v53 = vld [vmem:[#allocation2 + $0x80] sm:$0xff] }
 0x3f4   :  { %1973 = vpow2.f32 %v1903_v47  ;;  %v2970_v47 = vld [vmem:[#allocation2 + $0xa8] sm:$0xff] }
 0x3f5   :  { %1975 = vpow2.f32 %v1904_v52  ;;  %v2985_v52 = vld [vmem:[#allocation2 + $0x98] sm:$0xff] }
 0x3f6   :  { %1977 = vtanh.f32 %v1107_v55  ;;  %v2991_v55 = vld [vmem:[#allocation2 + $0x90] sm:$0xff] }
 0x3f7   :  { %3408 = vst [vmem:[#allocation16_spill] sm:$0xff] %v2991_v55 }
 0x3ff   :  { %v1972_v56 = vpop.eup %1971 }
 0x400   :  { %v1117_v57 = vadd.f32 1.0, %v1972_v56  ;;  %v2994_v56 = vld [vmem:[#allocation2 + $0x68] sm:$0xff] }
 0x401   :  { %v1974_v58 = vpop.eup %1973  ;;  %3409 = vst [vmem:[#allocation37_spill] sm:$0xff] %v2994_v56 }
 0x402   :  { %1979 = vrcp.f32 %v1117_v57  ;;  %v1118_v9 = vadd.f32 1.0, %v1974_v58  ;;  %v1976_v6 = vpop.eup %1975  ;;  %v2997_v57 = vld [vmem:[#allocation2 + $0x78] sm:$0xff]  ;;  %v3000_v58 = vld [vmem:[#allocation2 + $0x60] sm:$0xff] }
 0x403   :  { %v1978_v36 = vpop.eup %1977  ;;  %v1119_v15 = vadd.f32 1.0, %v1976_v6  ;;  %3410 = vst [vmem:[#allocation39_spill] sm:$0xff] %v2997_v57  ;;  %3411 = vst [vmem:[#allocation38_spill] sm:$0xff] %v3000_v58  ;;  %v3006_v6 = vld [vmem:[#allocation2 + $0x48] sm:$0xff] }
 0x404   :  { %1981 = vrcp.f32 %v1118_v9  ;;  %v3003_v9 = vld [vmem:[#allocation2 + $0x70] sm:$0xff]  ;;  %3413 = vst [vmem:[#allocation20_spill] sm:$0xff] %v3006_v6 }
 0x405   :  { %1983 = vrcp.f32 %v1119_v15  ;;  %3412 = vst [vmem:[#allocation40_spill] sm:$0xff] %v3003_v9  ;;  %v3021_v15 = vld [vmem:[#allocation2 + $0x38] sm:$0xff] }
 0x406   :  { %3418 = vst [vmem:[#allocation25_spill] sm:$0xff] %v3021_v15 }
 0x40f   :  { %v1980_v12 = vpop.eup %1979 }
 0x410   :  { %v1128_v13 = vmul.f32 %v1980_v12, %v1978_v36  ;;  %v3009_v36 = vld [vmem:[#allocation2 + $0x58] sm:$0xff]  ;;  %v3012_v12 = vld [vmem:[#allocation2 + $0x40] sm:$0xff] }
 0x411   :  { %v1982_v14 = vpop.eup %1981  ;;  %3414 = vst [vmem:[#allocation21_spill] sm:$0xff] %v3009_v36  ;;  %3415 = vst [vmem:[#allocation22_spill] sm:$0xff] %v3012_v12 }
 0x412   :  { %v1127_v16 = vmul.f32 %v1982_v14, %v2779_v62  ;;  %v1984_v19 = vpop.eup %1983  ;;  %v2946_v62 = vld [vmem:[#allocation2 + $0xe8] sm:$0xff] }
 0x413   :  { %v3018_v14 = vld [vmem:[#allocation2 + $0x28] sm:$0xff] }
 0x414   :  { %v2901_v17 = vadd.f32 %v1128_v13, %v1127_v16  ;;  %v3015_v13 = vld [vmem:[#allocation2 + $0x50] sm:$0xff]  ;;  %3417 = vst [vmem:[#allocation24_spill] sm:$0xff] %v3018_v14  ;;  %v3024_v16 = vld [vmem:[#allocation2 + $0x20] sm:$0xff] }
 0x415   :  { %3416 = vst [vmem:[#allocation23_spill] sm:$0xff] %v3015_v13  ;;  %3419 = vst [vmem:[#allocation26_spill] sm:$0xff] %v3024_v16 }
 0x416   :  { %1985 = vtanh.f32 %v2901_v17 }
 0x423   :  { %v1986_v20 = vpop.eup %1985 }
 0x424   :  { %v1131_v21 = vmul.f32 %v1986_v20, %v1984_v19  ;;  %v3027_v19 = vld [vmem:[#allocation2 + $0x30] sm:$0xff]  ;;  %v3030_v20 = vld [vmem:[#allocation2 + $0x8] sm:$0xff] }
 0x425   :  { %3420 = vst [vmem:[#allocation27_spill] sm:$0xff] %v3027_v19  ;;  %3421 = vst [vmem:[#allocation28_spill] sm:$0xff] %v3030_v20 }
 0x426   :  { %1204 = vmatmul.mubr.f32.vlgmr.msra.gmra.mxu0 %v1131_v21  ;;  %1275 = vmatmul.mubr.f32.vlgmr.msra.gmra.mxu1 %v1131_v21  ;;  %v3033_v21 = vld [vmem:[#allocation2 + $0x18] sm:$0xff] }
 0x427   :  { %1317 = vmatpush1.msra.mxu0 %v2782_v8  ;;  %1388 = vmatpush1.msra.mxu1 %v2785_v3  ;;  %3422 = vst [vmem:[#allocation29_spill] sm:$0xff] %v3033_v21 }
 0x428   :  { %1318 = vmatprep.subr.mxu0 %v2788_v27  ;;  %1389 = vmatprep.subr.mxu1 %v2791_v1 }
 0x429   :  { %1319 = vmatpush1.msra.mxu0 %v2794_v2  ;;  %1390 = vmatpush1.msra.mxu1 %v2797_v63 }
 0x42a   :  { %1320 = vmatprep.subr.mxu0 %v2800_v60  ;;  %1391 = vmatprep.subr.mxu1 %v2803_v5 }
 0x42b   :  { %1321 = vmatpush1.msra.mxu0 %v2806_v59  ;;  %1392 = vmatpush1.msra.mxu1 %v2809_v11 }
 0x42c   :  { %1322 = vmatprep.subr.mxu0 %v2812_v45  ;;  %1393 = vmatprep.subr.mxu1 %v2815_v18 }
 0x42d   :  { %1323 = vmatpush1.msra.mxu0 %v2818_v7  ;;  %1394 = vmatpush1.msra.mxu1 %v2821_v10 }
 0x42e   :  { %1324 = vmatprep.subr.mxu0 %v2824_v61  ;;  %1395 = vmatprep.subr.mxu1 %v2827_v34 }
 0x42f   :  { %1325 = vmatpush1.msra.mxu0 %v3406_v22  ;;  %1396 = vmatpush1.msra.mxu1 %v3407_v23 }
 0x430   :  { %1326 = vmatprep.subr.mxu0 %v2836_v38  ;;  %1397 = vmatprep.subr.mxu1 %v2839_v54 }
 0x431   :  { %1327 = vmatpush1.msra.mxu0 %v2842_v0  ;;  %1398 = vmatpush1.msra.mxu1 %v2845_v4 }
 0x432   :  { %1328 = vmatprep.subr.mxu0 %v2848_v35  ;;  %1399 = vmatprep.subr.mxu1 %v2851_v37 }
 0x433   :  { %1329 = vmatpush1.msra.mxu0 %v2928_v24  ;;  %1400 = vmatpush1.msra.mxu1 %v2931_v25 }
 0x434   :  { %1330 = vmatprep.subr.mxu0 %v2934_v26  ;;  %1401 = vmatprep.subr.mxu1 %v2937_v28 }
 0x435   :  { %1331 = vmatpush1.msra.mxu0 %v2940_v29  ;;  %1402 = vmatpush1.msra.mxu1 %v2943_v31 }
 0x436   :  { %1332 = vmatprep.subr.mxu0 %v2946_v62  ;;  %1403 = vmatprep.subr.mxu1 %v2949_v39 }
 0x437   :  { %1333 = vmatpush1.msra.mxu0 %v2952_v40  ;;  %1404 = vmatpush1.msra.mxu1 %v2955_v41 }
 0x438   :  { %1334 = vmatprep.subr.mxu0 %v2958_v42  ;;  %1405 = vmatprep.subr.mxu1 %v2961_v43 }
 0x439   :  { %1335 = vmatpush1.msra.mxu0 %v2964_v44  ;;  %1406 = vmatpush1.msra.mxu1 %v2967_v46 }
 0x43a   :  { %1336 = vmatprep.subr.mxu0 %v2970_v47  ;;  %1407 = vmatprep.subr.mxu1 %v2973_v48 }
 0x43b   :  { %1337 = vmatpush1.msra.mxu0 %v2976_v49  ;;  %1408 = vmatpush1.msra.mxu1 %v2979_v50 }
 0x43c   :  { %1338 = vmatprep.subr.mxu0 %v2982_v51  ;;  %1409 = vmatprep.subr.mxu1 %v2985_v52 }
 0x43d   :  { %1339 = vmatpush1.msra.mxu0 %v2988_v53  ;;  %1410 = vmatpush1.msra.mxu1 %v2991_v55 }
 0x43e   :  { %1340 = vmatprep.subr.mxu0 %v2994_v56  ;;  %1411 = vmatprep.subr.mxu1 %v2997_v57 }
 0x43f   :  { %1341 = vmatpush1.msra.mxu0 %v3000_v58  ;;  %1412 = vmatpush1.msra.mxu1 %v3003_v9  ;;  %v3427_v9 = vld [vmem:[#allocation50_spill] sm:$0xff] }
 0x440   :  { %1342 = vmatprep.subr.mxu0 %v3006_v6  ;;  %1413 = vmatprep.subr.mxu1 %v3009_v36 }
 0x441   :  { %1343 = vmatpush1.msra.mxu0 %v3012_v12  ;;  %1414 = vmatpush1.msra.mxu1 %v3015_v13  ;;  %v3426_v12 = vld [vmem:[#allocation51_spill] sm:$0xff] }
 0x442   :  { %1344 = vmatprep.subr.mxu0 %v3018_v14  ;;  %1415 = vmatprep.subr.mxu1 %v3021_v15  ;;  %v3036_v14 = vld [vmem:[#allocation2] sm:$0xff]  ;;  %v3040_v15 = vld [vmem:[#allocation2 + $0x10] sm:$0xff] }
 0x443   :  { %1345 = vmatpush1.msra.mxu0 %v3024_v16  ;;  %1416 = vmatpush1.msra.mxu1 %v3027_v19  ;;  %3423 = vst [vmem:[#allocation30_spill] sm:$0xff] %v3036_v14  ;;  %3424 = vst [vmem:[#allocation31_spill] sm:$0xff] %v3040_v15  ;;  %v3425_v19 = vld [vmem:[#allocation49_spill] sm:$0xff] }
 0x444   :  { %1346 = vmatprep.subr.mxu0 %v3030_v20  ;;  %1417 = vmatprep.subr.mxu1 %v3033_v21 }
 0x445   :  { %1347 = vmatpush1.msra.mxu0 %v3036_v14  ;;  %1380 = vmatprep.mubr.f32.mxu0 %v3392_v30 }
 0x446   :  { %1418 = vmatpush1.msra.mxu1 %v3040_v15  ;;  %1451 = vmatprep.mubr.f32.mxu1 %v3392_v30  ;;  %v3428_v30 = vld [vmem:[#allocation52_spill] sm:$0xff] }
 0x447   :  { %1493 = vmatprep.subr.mxu0 %v2768_v32  ;;  %1564 = vmatprep.subr.mxu1 %v2771_v33 }
 0x4e6   :  { %v1205_v20 = vpop.f32.mrf.mxu0  ;;  %v1276_v6 = vpop.f32.mrf.mxu1 }
 0x4e7   :  { %v1281_v16 = vadd.f32 %v1205_v20, %v3425_v19  ;;  %v1283_v58 = vadd.f32 %v1276_v6, %v3427_v9 }
 0x4e8   :  { %v1207_v21 = vpop.f32.mrf.mxu0  ;;  %v1278_v15 = vpop.f32.mrf.mxu1 }
 0x4e9   :  { %v1905_v13 = vmul.f32 -1.442695, %v1281_v16  ;;  %v1282_v36 = vadd.f32 %v1207_v21, %v3426_v12  ;;  %v1907_v57 = vmul.f32 -1.442695, %v1283_v58  ;;  %v1284_v56 = vadd.f32 %v1278_v15, %v3428_v30  ;;  %v3433_v58 = vld [vmem:[#allocation40_spill] sm:$0xff]  ;;  %v3435_v21 = vld [vmem:[#allocation21_spill] sm:$0xff] }
 0x4ea   :  { %v3434_v15 = vld [vmem:[#allocation20_spill] sm:$0xff] }
 0x4eb   :  { %1987 = vpow2.f32 %v1905_v13  ;;  %v1906_v14 = vmul.f32 -1.442695, %v1282_v36 }
 0x4ed   :  { %1989 = vpow2.f32 %v1906_v14 }
 0x4ee   :  { %1991 = vpow2.f32 %v1907_v57 }
 0x4ef   :  { %1993 = vtanh.f32 %v1284_v56  ;;  %v3432_v56 = vld [vmem:[#allocation38_spill] sm:$0xff] }
 0x4f8   :  { %v1988_v32 = vpop.eup %1987 }
 0x4f9   :  { %v1294_v55 = vadd.f32 1.0, %v1988_v32 }
 0x4fa   :  { %v1990_v33 = vpop.eup %1989 }
 0x4fb   :  { %1995 = vrcp.f32 %v1294_v55  ;;  %v1295_v19 = vadd.f32 1.0, %v1990_v33  ;;  %v1992_v16 = vpop.eup %1991  ;;  %v3429_v33 = vld [vmem:[#allocation16_spill] sm:$0xff]  ;;  %v3431_v55 = vld [vmem:[#allocation39_spill] sm:$0xff] }
 0x4fc   :  { %v1994_v12 = vpop.eup %1993  ;;  %v1296_v20 = vadd.f32 1.0, %v1992_v16  ;;  %v3437_v16 = vld [vmem:[#allocation23_spill] sm:$0xff] }
 0x4fd   :  { %1997 = vrcp.f32 %v1295_v19  ;;  %v3436_v19 = vld [vmem:[#allocation22_spill] sm:$0xff] }
 0x4fe   :  { %1999 = vrcp.f32 %v1296_v20  ;;  %v3442_v20 = vld [vmem:[#allocation28_spill] sm:$0xff] }
 0x508   :  { %v1996_v13 = vpop.eup %1995 }
 0x509   :  { %v1305_v36 = vmul.f32 %v1996_v13, %v1994_v12  ;;  %v3438_v12 = vld [vmem:[#allocation24_spill] sm:$0xff]  ;;  %v3439_v13 = vld [vmem:[#allocation25_spill] sm:$0xff] }
 0x50a   :  { %v1998_v14 = vpop.eup %1997 }
 0x50b   :  { %v1304_v9 = vmul.f32 %v1998_v14, %v2901_v17  ;;  %v2000_v30 = vpop.eup %1999  ;;  %v3430_v17 = vld [vmem:[#allocation37_spill] sm:$0xff]  ;;  %v3441_v14 = vld [vmem:[#allocation27_spill] sm:$0xff] }
 0x50d   :  { %v3051_v6 = vadd.f32 %v1305_v36, %v1304_v9  ;;  %v3440_v36 = vld [vmem:[#allocation26_spill] sm:$0xff]  ;;  %v3443_v9 = vld [vmem:[#allocation29_spill] sm:$0xff] }
 0x50f   :  { %2001 = vtanh.f32 %v3051_v6 }
 0x51c   :  { %v2002_v32 = vpop.eup %2001 }
 0x51d   :  { %v1308_v57 = vmul.f32 %v2002_v32, %v2000_v30  ;;  %v3444_v30 = vld [vmem:[#allocation30_spill] sm:$0xff]  ;;  %v3445_v32 = vmov 0.0  }
 0x51f   :  { %1381 = vmatmul.mubr.f32.vlgmr.msra.gmra.mxu0 %v1308_v57  ;;  %1452 = vmatmul.mubr.f32.vlgmr.msra.gmra.mxu1 %v1308_v57  ;;  %v3446_v57 = vld [vmem:[#allocation31_spill] sm:$0xff] }
 0x520   :  { %1494 = vmatpush1.msra.mxu0 %v2782_v8  ;;  %1565 = vmatpush1.msra.mxu1 %v2785_v3 }
 0x521   :  { %1495 = vmatprep.subr.mxu0 %v2788_v27  ;;  %1566 = vmatprep.subr.mxu1 %v2791_v1 }
 0x522   :  { %1496 = vmatpush1.msra.mxu0 %v2794_v2  ;;  %1567 = vmatpush1.msra.mxu1 %v2797_v63 }
 0x523   :  { %1497 = vmatprep.subr.mxu0 %v2800_v60  ;;  %1568 = vmatprep.subr.mxu1 %v2803_v5 }
 0x524   :  { %1498 = vmatpush1.msra.mxu0 %v2806_v59  ;;  %1569 = vmatpush1.msra.mxu1 %v2809_v11 }
 0x525   :  { %1499 = vmatprep.subr.mxu0 %v2812_v45  ;;  %1570 = vmatprep.subr.mxu1 %v2815_v18 }
 0x526   :  { %1500 = vmatpush1.msra.mxu0 %v2818_v7  ;;  %1571 = vmatpush1.msra.mxu1 %v2821_v10 }
 0x527   :  { %1501 = vmatprep.subr.mxu0 %v2824_v61  ;;  %1572 = vmatprep.subr.mxu1 %v2827_v34 }
 0x528   :  { %1502 = vmatpush1.msra.mxu0 %v3406_v22  ;;  %1573 = vmatpush1.msra.mxu1 %v3407_v23 }
 0x529   :  { %1503 = vmatprep.subr.mxu0 %v2836_v38  ;;  %1574 = vmatprep.subr.mxu1 %v2839_v54 }
 0x52a   :  { %1504 = vmatpush1.msra.mxu0 %v2842_v0  ;;  %1575 = vmatpush1.msra.mxu1 %v2845_v4 }
 0x52b   :  { %1505 = vmatprep.subr.mxu0 %v2848_v35  ;;  %1576 = vmatprep.subr.mxu1 %v2851_v37 }
 0x52c   :  { %1506 = vmatpush1.msra.mxu0 %v2928_v24  ;;  %1577 = vmatpush1.msra.mxu1 %v2931_v25 }
 0x52d   :  { %1507 = vmatprep.subr.mxu0 %v2934_v26  ;;  %1578 = vmatprep.subr.mxu1 %v2937_v28 }
 0x52e   :  { %1508 = vmatpush1.msra.mxu0 %v2940_v29  ;;  %1579 = vmatpush1.msra.mxu1 %v2943_v31 }
 0x52f   :  { %1509 = vmatprep.subr.mxu0 %v2946_v62  ;;  %1580 = vmatprep.subr.mxu1 %v2949_v39 }
 0x530   :  { %1510 = vmatpush1.msra.mxu0 %v2952_v40  ;;  %1581 = vmatpush1.msra.mxu1 %v2955_v41 }
 0x531   :  { %1511 = vmatprep.subr.mxu0 %v2958_v42  ;;  %1582 = vmatprep.subr.mxu1 %v2961_v43 }
 0x532   :  { %1512 = vmatpush1.msra.mxu0 %v2964_v44  ;;  %1583 = vmatpush1.msra.mxu1 %v2967_v46 }
 0x533   :  { %1513 = vmatprep.subr.mxu0 %v2970_v47  ;;  %1584 = vmatprep.subr.mxu1 %v2973_v48 }
 0x534   :  { %1514 = vmatpush1.msra.mxu0 %v2976_v49  ;;  %1585 = vmatpush1.msra.mxu1 %v2979_v50 }
 0x535   :  { %1515 = vmatprep.subr.mxu0 %v2982_v51  ;;  %1586 = vmatprep.subr.mxu1 %v2985_v52 }
 0x536   :  { %1516 = vmatpush1.msra.mxu0 %v2988_v53  ;;  %1587 = vmatpush1.msra.mxu1 %v3429_v33 }
 0x537   :  { %1517 = vmatprep.subr.mxu0 %v3430_v17  ;;  %1588 = vmatprep.subr.mxu1 %v3431_v55 }
 0x538   :  { %1518 = vmatpush1.msra.mxu0 %v3432_v56  ;;  %1589 = vmatpush1.msra.mxu1 %v3433_v58  ;;  %v3451_v58 = vld [vmem:[#allocation54_spill] sm:$0xff] }
 0x539   :  { %1519 = vmatprep.subr.mxu0 %v3434_v15  ;;  %1590 = vmatprep.subr.mxu1 %v3435_v21 }
 0x53a   :  { %1520 = vmatpush1.msra.mxu0 %v3436_v19  ;;  %1591 = vmatpush1.msra.mxu1 %v3437_v16  ;;  %v3447_v16 = vld [vmem:[#allocation17_spill] sm:$0xff] }
 0x53b   :  { %1521 = vmatprep.subr.mxu0 %v3438_v12  ;;  %1592 = vmatprep.subr.mxu1 %v3439_v13  ;;  %v3448_v12 = vld [vmem:[#allocation18_spill] sm:$0xff] }
 0x53c   :  { %1522 = vmatpush1.msra.mxu0 %v3440_v36  ;;  %1593 = vmatpush1.msra.mxu1 %v3441_v14  ;;  %v3449_v36 = vld [vmem:[#allocation53_spill] sm:$0xff] }
 0x53d   :  { %1523 = vmatprep.subr.mxu0 %v3442_v20  ;;  %1594 = vmatprep.subr.mxu1 %v3443_v9  ;;  %v3450_v20 = vld [vmem:[#allocation55_spill] sm:$0xff] }
 0x53e   :  { %1524 = vmatpush1.msra.mxu0 %v3444_v30  ;;  %1557 = vmatprep.mubr.f32.mxu0 %v3445_v32 }
 0x53f   :  { %1595 = vmatpush1.msra.mxu1 %v3446_v57  ;;  %1628 = vmatprep.mubr.f32.mxu1 %v3445_v32  ;;  %v3452_v32 = vld [vmem:[#allocation56_spill] sm:$0xff] }
 0x540   :  { %1670 = vmatprep.subr.mxu0 %v3447_v16  ;;  %1741 = vmatprep.subr.mxu1 %v3448_v12 }
 0x5df   :  { %v1382_v13 = vpop.f32.mrf.mxu0  ;;  %v1453_v30 = vpop.f32.mrf.mxu1 }
 0x5e0   :  { %v1458_v19 = vadd.f32 %v1382_v13, %v3449_v36  ;;  %v1460_v56 = vadd.f32 %v1453_v30, %v3451_v58 }
 0x5e1   :  { %v1384_v14 = vpop.f32.mrf.mxu0  ;;  %v1455_v57 = vpop.f32.mrf.mxu1 }
 0x5e2   :  { %v1908_v21 = vmul.f32 -1.442695, %v1458_v19  ;;  %v1459_v15 = vadd.f32 %v1384_v14, %v3450_v20  ;;  %v1910_v55 = vmul.f32 -1.442695, %v1460_v56  ;;  %v1461_v17 = vadd.f32 %v1455_v57, %v3452_v32  ;;  %v3475_v57 = vld [vmem:[#allocation61_spill] sm:$0xff] }
 0x5e4   :  { %2003 = vpow2.f32 %v1908_v21  ;;  %v1909_v9 = vmul.f32 -1.442695, %v1459_v15 }
 0x5e6   :  { %2005 = vpow2.f32 %v1909_v9 }
 0x5e7   :  { %2007 = vpow2.f32 %v1910_v55 }
 0x5e8   :  { %2009 = vtanh.f32 %v1461_v17 }
 0x5f1   :  { %v2004_v16 = vpop.eup %2003 }
 0x5f2   :  { %v1471_v33 = vadd.f32 1.0, %v2004_v16 }
 0x5f3   :  { %v2006_v12 = vpop.eup %2005 }
 0x5f4   :  { %2011 = vrcp.f32 %v1471_v33  ;;  %v1472_v13 = vadd.f32 1.0, %v2006_v12  ;;  %v2008_v19 = vpop.eup %2007 }
 0x5f5   :  { %v2010_v36 = vpop.eup %2009  ;;  %v1473_v20 = vadd.f32 1.0, %v2008_v19  ;;  %v3476_v19 = vld [vmem:[#allocation63_spill] sm:$0xff] }
 0x5f6   :  { %2013 = vrcp.f32 %v1472_v13 }
 0x5f7   :  { %2015 = vrcp.f32 %v1473_v20 }
 0x601   :  { %v2012_v21 = vpop.eup %2011 }
 0x602   :  { %v1482_v15 = vmul.f32 %v2012_v21, %v2010_v36 }
 0x603   :  { %v2014_v14 = vpop.eup %2013 }
 0x604   :  { %v1481_v58 = vmul.f32 %v2014_v14, %v3051_v6  ;;  %v2016_v56 = vpop.eup %2015  ;;  %v3477_v14 = vld [vmem:[#allocation62_spill] sm:$0xff] }
 0x606   :  { %v3125_v9 = vadd.f32 %v1482_v15, %v1481_v58 }
 0x608   :  { %2017 = vtanh.f32 %v3125_v9 }
 0x615   :  { %v2018_v55 = vpop.eup %2017 }
 0x616   :  { %v1485_v30 = vmul.f32 %v2018_v55, %v2016_v56  ;;  %v3478_v56 = vld [vmem:[#allocation64_spill] sm:$0xff] }
 0x618   :  { %1558 = vmatmul.mubr.f32.vlgmr.msra.gmra.mxu0 %v1485_v30  ;;  %1629 = vmatmul.mubr.f32.vlgmr.msra.gmra.mxu1 %v1485_v30 }
 0x619   :  { %1671 = vmatpush1.msra.mxu0 %v2782_v8  ;;  %1742 = vmatpush1.msra.mxu1 %v2785_v3  ;;  %v3453_v8 = vld [vmem:[#allocation16_spill] sm:$0xff]  ;;  %v3454_v3 = vld [vmem:[#allocation37_spill] sm:$0xff] }
 0x61a   :  { %1672 = vmatprep.subr.mxu0 %v2788_v27  ;;  %1743 = vmatprep.subr.mxu1 %v2791_v1  ;;  %v3455_v27 = vld [vmem:[#allocation39_spill] sm:$0xff]  ;;  %v3456_v1 = vld [vmem:[#allocation38_spill] sm:$0xff] }
 0x61b   :  { %1673 = vmatpush1.msra.mxu0 %v2794_v2  ;;  %1744 = vmatpush1.msra.mxu1 %v2797_v63  ;;  %v3457_v2 = vld [vmem:[#allocation40_spill] sm:$0xff] }
 0x61c   :  { %1674 = vmatprep.subr.mxu0 %v2800_v60  ;;  %1745 = vmatprep.subr.mxu1 %v2803_v5  ;;  %v3458_v63 = vld [vmem:[#allocation20_spill] sm:$0xff]  ;;  %v3459_v60 = vld [vmem:[#allocation21_spill] sm:$0xff]  ;;  %v3460_v5 = vld [vmem:[#allocation22_spill] sm:$0xff] }
 0x61d   :  { %1675 = vmatpush1.msra.mxu0 %v2806_v59  ;;  %1746 = vmatpush1.msra.mxu1 %v2809_v11  ;;  %v3461_v59 = vld [vmem:[#allocation23_spill] sm:$0xff]  ;;  %v3462_v11 = vld [vmem:[#allocation24_spill] sm:$0xff] }
 0x61e   :  { %1676 = vmatprep.subr.mxu0 %v2812_v45  ;;  %1747 = vmatprep.subr.mxu1 %v2815_v18  ;;  %v3463_v45 = vld [vmem:[#allocation25_spill] sm:$0xff]  ;;  %v3464_v18 = vld [vmem:[#allocation26_spill] sm:$0xff] }
 0x61f   :  { %1677 = vmatpush1.msra.mxu0 %v2818_v7  ;;  %1748 = vmatpush1.msra.mxu1 %v2821_v10  ;;  %v3465_v7 = vld [vmem:[#allocation27_spill] sm:$0xff]  ;;  %v3466_v10 = vld [vmem:[#allocation28_spill] sm:$0xff] }
 0x620   :  { %1678 = vmatprep.subr.mxu0 %v2824_v61  ;;  %1749 = vmatprep.subr.mxu1 %v2827_v34  ;;  %v3467_v61 = vld [vmem:[#allocation29_spill] sm:$0xff]  ;;  %v3468_v34 = vld [vmem:[#allocation30_spill] sm:$0xff] }
 0x621   :  { %1679 = vmatpush1.msra.mxu0 %v3406_v22  ;;  %1750 = vmatpush1.msra.mxu1 %v3407_v23  ;;  %v3472_v23 = vld [vmem:[#allocation59_spill] sm:$0xff] }
 0x622   :  { %1680 = vmatprep.subr.mxu0 %v2836_v38  ;;  %1751 = vmatprep.subr.mxu1 %v2839_v54  ;;  %v3471_v54 = vld [vmem:[#allocation57_spill] sm:$0xff] }
 0x623   :  { %1681 = vmatpush1.msra.mxu0 %v2842_v0  ;;  %1752 = vmatpush1.msra.mxu1 %v2845_v4 }
 0x624   :  { %1682 = vmatprep.subr.mxu0 %v2848_v35  ;;  %1753 = vmatprep.subr.mxu1 %v2851_v37  ;;  %v3469_v35 = vmov 0.0   ;;  %v3470_v37 = vld [vmem:[#allocation31_spill] sm:$0xff] }
 0x625   :  { %1683 = vmatpush1.msra.mxu0 %v2928_v24  ;;  %1754 = vmatpush1.msra.mxu1 %v2931_v25 }
 0x626   :  { %1684 = vmatprep.subr.mxu0 %v2934_v26  ;;  %1755 = vmatprep.subr.mxu1 %v2937_v28  ;;  %v3473_v28 = vld [vmem:[#allocation58_spill] sm:$0xff] }
 0x627   :  { %1685 = vmatpush1.msra.mxu0 %v2940_v29  ;;  %1756 = vmatpush1.msra.mxu1 %v2943_v31 }
 0x628   :  { %1686 = vmatprep.subr.mxu0 %v2946_v62  ;;  %1757 = vmatprep.subr.mxu1 %v2949_v39  ;;  %v3474_v39 = vld [vmem:[#allocation60_spill] sm:$0xff] }
 0x629   :  { %1687 = vmatpush1.msra.mxu0 %v2952_v40  ;;  %1758 = vmatpush1.msra.mxu1 %v2955_v41 }
 0x62a   :  { %1688 = vmatprep.subr.mxu0 %v2958_v42  ;;  %1759 = vmatprep.subr.mxu1 %v2961_v43 }
 0x62b   :  { %1689 = vmatpush1.msra.mxu0 %v2964_v44  ;;  %1760 = vmatpush1.msra.mxu1 %v2967_v46 }
 0x62c   :  { %1690 = vmatprep.subr.mxu0 %v2970_v47  ;;  %1761 = vmatprep.subr.mxu1 %v2973_v48 }
 0x62d   :  { %1691 = vmatpush1.msra.mxu0 %v2976_v49  ;;  %1762 = vmatpush1.msra.mxu1 %v2979_v50 }
 0x62e   :  { %1692 = vmatprep.subr.mxu0 %v2982_v51  ;;  %1763 = vmatprep.subr.mxu1 %v2985_v52 }
 0x62f   :  { %1693 = vmatpush1.msra.mxu0 %v2988_v53  ;;  %1764 = vmatpush1.msra.mxu1 %v3453_v8 }
 0x630   :  { %1694 = vmatprep.subr.mxu0 %v3454_v3  ;;  %1765 = vmatprep.subr.mxu1 %v3455_v27 }
 0x631   :  { %1695 = vmatpush1.msra.mxu0 %v3456_v1  ;;  %1766 = vmatpush1.msra.mxu1 %v3457_v2 }
 0x632   :  { %1696 = vmatprep.subr.mxu0 %v3458_v63  ;;  %1767 = vmatprep.subr.mxu1 %v3459_v60 }
 0x633   :  { %1697 = vmatpush1.msra.mxu0 %v3460_v5  ;;  %1768 = vmatpush1.msra.mxu1 %v3461_v59 }
 0x634   :  { %1698 = vmatprep.subr.mxu0 %v3462_v11  ;;  %1769 = vmatprep.subr.mxu1 %v3463_v45 }
 0x635   :  { %1699 = vmatpush1.msra.mxu0 %v3464_v18  ;;  %1770 = vmatpush1.msra.mxu1 %v3465_v7 }
 0x636   :  { %1700 = vmatprep.subr.mxu0 %v3466_v10  ;;  %1771 = vmatprep.subr.mxu1 %v3467_v61 }
 0x637   :  { %1701 = vmatpush1.msra.mxu0 %v3468_v34  ;;  %1734 = vmatprep.mubr.f32.mxu0 %v3469_v35 }
 0x638   :  { %1772 = vmatpush1.msra.mxu1 %v3470_v37  ;;  %1805 = vmatprep.mubr.f32.mxu1 %v3469_v35 }
 0x6d8   :  { %v1559_v38 = vpop.f32.mrf.mxu0  ;;  %v1630_v26 = vpop.f32.mrf.mxu1 }
 0x6d9   :  { %v1635_v0 = vadd.f32 %v1559_v38, %v3471_v54  ;;  %v1637_v29 = vadd.f32 %v1630_v26, %v3473_v28 }
 0x6da   :  { %v1561_v4 = vpop.f32.mrf.mxu0  ;;  %v1632_v31 = vpop.f32.mrf.mxu1 }
 0x6db   :  { %v1911_v22 = vmul.f32 -1.442695, %v1635_v0  ;;  %v1636_v24 = vadd.f32 %v1561_v4, %v3472_v23  ;;  %v1913_v62 = vmul.f32 -1.442695, %v1637_v29  ;;  %v1638_v40 = vadd.f32 %v1632_v31, %v3474_v39 }
 0x6dd   :  { %2019 = vpow2.f32 %v1911_v22  ;;  %v1912_v25 = vmul.f32 -1.442695, %v1636_v24 }
 0x6df   :  { %2021 = vpow2.f32 %v1912_v25 }
 0x6e0   :  { %2023 = vpow2.f32 %v1913_v62 }
 0x6e1   :  { %2025 = vtanh.f32 %v1638_v40 }
 0x6ea   :  { %v2020_v41 = vpop.eup %2019 }
 0x6eb   :  { %v1648_v42 = vadd.f32 1.0, %v2020_v41 }
 0x6ec   :  { %v2022_v43 = vpop.eup %2021 }
 0x6ed   :  { %2027 = vrcp.f32 %v1648_v42  ;;  %v1649_v44 = vadd.f32 1.0, %v2022_v43  ;;  %v2024_v46 = vpop.eup %2023 }
 0x6ee   :  { %v2026_v47 = vpop.eup %2025  ;;  %v1650_v51 = vadd.f32 1.0, %v2024_v46 }
 0x6ef   :  { %2029 = vrcp.f32 %v1649_v44 }
 0x6f0   :  { %2031 = vrcp.f32 %v1650_v51 }
 0x6fa   :  { %v2028_v48 = vpop.eup %2027 }
 0x6fb   :  { %v1659_v49 = vmul.f32 %v2028_v48, %v2026_v47 }
 0x6fc   :  { %v2030_v50 = vpop.eup %2029 }
 0x6fd   :  { %v1658_v52 = vmul.f32 %v2030_v50, %v3125_v9  ;;  %v2032_v6 = vpop.eup %2031 }
 0x6ff   :  { %v1660_v53 = vadd.f32 %v1659_v49, %v1658_v52 }
 0x701   :  { %2033 = vtanh.f32 %v1660_v53 }
 0x70e   :  { %v2034_v33 = vpop.eup %2033 }
 0x70f   :  { %v1662_v17 = vmul.f32 %v2034_v33, %v2032_v6 }
 0x711   :  { %1735 = vmatmul.mubr.f32.vlgmr.msra.gmra.mxu0 %v1662_v17  ;;  %1806 = vmatmul.mubr.f32.vlgmr.msra.gmra.mxu1 %v1662_v17 }
 0x7d1   :  { %v1736_v32 = vpop.f32.mrf.mxu0  ;;  %v1807_v15 = vpop.f32.mrf.mxu1 }
 0x7d2   :  { %v1812_v16 = vadd.f32 %v1736_v32, %v3475_v57  ;;  %v1814_v20 = vadd.f32 %v1807_v15, %v3477_v14 }
 0x7d3   :  { %v1738_v12 = vpop.f32.mrf.mxu0  ;;  %v1809_v58 = vpop.f32.mrf.mxu1 }
 0x7d4   :  { %v1914_v13 = vmul.f32 -1.442695, %v1812_v16  ;;  %v1813_v36 = vadd.f32 %v1738_v12, %v3476_v19  ;;  %v1916_v9 = vmul.f32 -1.442695, %v1814_v20  ;;  %v1815_v55 = vadd.f32 %v1809_v58, %v3478_v56 }
 0x7d6   :  { %2035 = vpow2.f32 %v1914_v13  ;;  %v1915_v21 = vmul.f32 -1.442695, %v1813_v36 }
 0x7d8   :  { %2037 = vpow2.f32 %v1915_v21 }
 0x7d9   :  { %2039 = vpow2.f32 %v1916_v9 }
 0x7da   :  { %2041 = vtanh.f32 %v1815_v55 }
 0x7e3   :  { %v2036_v30 = vpop.eup %2035 }
 0x7e4   :  { %v1825_v8 = vadd.f32 1.0, %v2036_v30 }
 0x7e5   :  { %v2038_v3 = vpop.eup %2037 }
 0x7e6   :  { %2043 = vrcp.f32 %v1825_v8  ;;  %v1826_v27 = vadd.f32 1.0, %v2038_v3  ;;  %v2040_v1 = vpop.eup %2039 }
 0x7e7   :  { %v2042_v2 = vpop.eup %2041  ;;  %v1827_v59 = vadd.f32 1.0, %v2040_v1 }
 0x7e8   :  { %2045 = vrcp.f32 %v1826_v27 }
 0x7e9   :  { %2047 = vrcp.f32 %v1827_v59 }
 0x7f3   :  { %v2044_v63 = vpop.eup %2043 }
 0x7f4   :  { %v1836_v60 = vmul.f32 %v2044_v63, %v2042_v2 }
 0x7f5   :  { %v2046_v5 = vpop.eup %2045 }
 0x7f6   :  { %v1835_v11 = vmul.f32 %v2046_v5, %v1660_v53  ;;  %v2048_v18 = vpop.eup %2047 }
 0x7f8   :  { %v1837_v45 = vadd.f32 %v1836_v60, %v1835_v11 }
 0x7fa   :  { %2049 = vtanh.f32 %v1837_v45  ;;  %1847 = vst [vmem:[#allocation7 + $0x8] sm:$0xff] %v1837_v45 }
 0x807   :  { %v2050_v7 = vpop.eup %2049 }
 0x808   :  { %v1839_v10 = vmul.f32 %v2050_v7, %v2048_v18 }
 0x80a   :  { %1845 = vst [vmem:[#allocation7] sm:$0xff] %v1839_v10 }
 0x80b   :  { %2146 = shalt.err (!%p2143_p9)
}
 0x80c   :  { %s2162_s26 = smov 128   ;;  %s2163_s27 = smov 8  }
 0x80d   :  { %1859 = dma.vmem_to_hbm [thread:$0]  %s1854_s25, 256, %s3208_s4, [#allocation8], %s2162_s26, %s2162_s26, %s2163_s27  }
 0x80e   :  { %2157 = dma.done.wait [#allocation8], 256  }
 0x80f   :  { %2158 = vsyncadd [#allocation8], 4294967040 }
 0x810   :  { %1863 = vsyncpa [#allocation8], 1 }
 0x811   :  { %1864 = vsyncmov [#allocation6] }
 0x814   :  { %s1865_s30 = vpop.sfrf %1864 }
 0x815   :  { %p1917_p10 = scmp.ne.s32.totalorder %s1865_s30, 0 }
 0x817   :  { %1869 = shalt.err (%p1917_p10)  }

</bundles_post_ra>
